<compile_context>
chip_gen: v7x
topology: tpu7x:2x2x1
jax: 0.10.0
libtpu: 0.0.40
codegen_flags: <defaults>
</compile_context>

<pallas_src>
import jax
import jax.numpy as jnp
from jax.experimental import pallas as pl
from jax.experimental.pallas import tpu as pltpu


# ---------------------------------------------------------------------------
# Fused kernel: all LSTM layers + FC head in one invocation (no grid).
# ---------------------------------------------------------------------------
def _make_fused_kernel(num_layers, hidden_size, seq_length, batch):
    H = hidden_size
    T = seq_length
    B = batch

    def kernel(*refs):
        # refs: x_tbi, w_ih0, w_hh0, b0, (w_cat_l, b_l)*[L-1],
        #       fc1_w, fc1_b, fc2_w, fc2_b, out
        x_ref = refs[0]
        w_ih0_ref, w_hh0_ref, b0_ref = refs[1:4]
        upper = refs[4:4 + 2 * (num_layers - 1)]
        w1_ref, bfc1_ref, w2_ref, bfc2_ref, out_ref = refs[4 + 2 * (num_layers - 1):]

        # Hoisted layer-0 input projection with the bias folded in:
        #   (T*B, I) @ (I, 4H) -> (T*B, 4H). Only h @ W_hh stays serial.
        xp0 = (jnp.dot(x_ref[...], w_ih0_ref[...],
                       preferred_element_type=jnp.float32) + b0_ref[...])

        # Hoist the (1,4H)->(B,4H) bias broadcasts out of the time loop
        # (JAX does not CSE broadcast_in_dim).
        upper_bias = [jnp.broadcast_to(upper[2 * i + 1][...], (B, 4 * H))
                      for i in range(num_layers - 1)]

        def lstm_cell(gates, c_prev):
            # Two full-(B,4H) transcendentals instead of four 32-lane ones.
            # PyTorch gate order: i, f, g, o.
            sg = jax.nn.sigmoid(gates)
            th = jnp.tanh(gates)
            i_g = sg[:, 0 * H:1 * H]
            f_g = sg[:, 1 * H:2 * H]
            g_g = th[:, 2 * H:3 * H]
            o_g = sg[:, 3 * H:4 * H]
            c_new = f_g * c_prev + i_g * g_g
            h_new = o_g * jnp.tanh(c_new)
            return h_new, c_new

        h = [jnp.zeros((B, H), jnp.float32) for _ in range(num_layers)]
        c = [jnp.zeros((B, H), jnp.float32) for _ in range(num_layers)]
        top_h = []

        for t in range(T):  # static trip count -> fully unrolled
            # Layer 0: contiguous per-step sublane slab from hoisted xp0.
            gates = xp0[t * B:(t + 1) * B, :] + jnp.dot(
                h[0], w_hh0_ref[...], preferred_element_type=jnp.float32)
            h[0], c[0] = lstm_cell(gates, c[0])

            # Layers >= 1: single fused (B,2H)@(2H,4H) matmul on the serial path.
            for l in range(1, num_layers):
                w_cat_ref = upper[2 * (l - 1)]
                hcat = jnp.concatenate([h[l - 1], h[l]], axis=1)
                gates = (jnp.dot(hcat, w_cat_ref[...],
                                 preferred_element_type=jnp.float32)
                         + upper_bias[l - 1])
                h[l], c[l] = lstm_cell(gates, c[l])

            top_h.append(h[num_layers - 1])

        # FC head: one lane-aligned K=T*H matmul over hidden states held in
        # vregs — no (B, T, H) intermediate, no per-step accumulate chain.
        flat = jnp.concatenate(top_h, axis=1)                     # (B, T*H)
        hidden = jnp.maximum(
            jnp.dot(flat, w1_ref[...], preferred_element_type=jnp.float32)
            + bfc1_ref[...], 0.0)
        out_ref[...] = (jnp.dot(hidden, w2_ref[...],
                                preferred_element_type=jnp.float32)
                        + bfc2_ref[...])

    return kernel


# ---------------------------------------------------------------------------
# Wrapper
# ---------------------------------------------------------------------------
@jax.jit
def lstm_model_forward(params, x_bti):
    # x_bti: (B, T, I), batch_first like PyTorch.
    num_layers = len(params["lstm"])
    B, T, I = x_bti.shape
    H = params["lstm"][0][1].shape[0]
    O = params["fc2_w"].shape[1]

    # Time-major flat layout so each per-step gate fetch in the kernel is a
    # contiguous (B, 4H) row block; the transpose/reshape is free wrapper XLA.
    x_tbi = jnp.transpose(x_bti.astype(jnp.float32), (1, 0, 2)).reshape(T * B, I)

    w_ih0, w_hh0, b0 = params["lstm"][0]
    args = [x_tbi, w_ih0, w_hh0, b0]
    for l in range(1, num_layers):
        args.append(params["lstm_cat"][l - 1])   # (2H, 4H), pre-concatenated
        args.append(params["lstm"][l][2])        # (1, 4H) combined bias
    args.extend((params["fc1_w"], params["fc1_b"],
                 params["fc2_w"], params["fc2_b"]))

    # TODO(synk): for large batch on v7x, add a batch grid axis with
    # dimension_semantics=("parallel",) to engage the second TensorCore.
    return pl.pallas_call(
        _make_fused_kernel(num_layers, H, T, B),
        out_shape=jax.ShapeDtypeStruct((B, O), jnp.float32),
        in_specs=[pl.BlockSpec(memory_space=pltpu.MemorySpace.VMEM)
                  for _ in args],
        out_specs=pl.BlockSpec(memory_space=pltpu.MemorySpace.VMEM),
    )(*args)


# ---------------------------------------------------------------------------
# Parameter init (weights stored pre-transposed as (in, out); biases combined;
# upper-layer W_ih/W_hh pre-concatenated into a single (2H, 4H) matrix).
# ---------------------------------------------------------------------------
def init_params(key, input_size, hidden_size, num_layers, output_size, seq_length):
    params = {"lstm": [], "lstm_cat": []}
    k = 1.0 / jnp.sqrt(hidden_size)
    keys = jax.random.split(key, num_layers * 4 + 4)
    ki = 0
    in_sz = input_size
    for layer in range(num_layers):
        w_ih = jax.random.uniform(keys[ki], (in_sz, 4 * hidden_size), jnp.float32, -k, k); ki += 1
        w_hh = jax.random.uniform(keys[ki], (hidden_size, 4 * hidden_size), jnp.float32, -k, k); ki += 1
        b_ih = jax.random.uniform(keys[ki], (1, 4 * hidden_size), jnp.float32, -k, k); ki += 1
        b_hh = jax.random.uniform(keys[ki], (1, 4 * hidden_size), jnp.float32, -k, k); ki += 1
        params["lstm"].append((w_ih, w_hh, b_ih + b_hh))
        if layer >= 1:
            # [h_{l-1}; h_l] @ [W_ih; W_hh]: one serial-path matmul per cell.
            params["lstm_cat"].append(jnp.concatenate([w_ih, w_hh], axis=0))
        in_sz = hidden_size
    kf = 1.0 / jnp.sqrt(hidden_size * seq_length)
    params["fc1_w"] = jax.random.uniform(keys[ki], (hidden_size * seq_length, hidden_size), jnp.float32, -kf, kf); ki += 1
    params["fc1_b"] = jax.random.uniform(keys[ki], (1, hidden_size), jnp.float32, -kf, kf); ki += 1
    kf2 = 1.0 / jnp.sqrt(hidden_size)
    params["fc2_w"] = jax.random.uniform(keys[ki], (hidden_size, output_size), jnp.float32, -kf2, kf2); ki += 1
    params["fc2_b"] = jax.random.uniform(keys[ki], (1, output_size), jnp.float32, -kf2, kf2); ki += 1
    return params


# ---------------------------------------------------------------------------
# Pure-JAX reference (same math) for a correctness sanity check.
# ---------------------------------------------------------------------------
def reference_forward(params, x_bti):
    H = params["lstm"][0][1].shape[0]
    x = x_bti.astype(jnp.float32)
    B, T, _ = x.shape
    layer_in = x
    for (w_ih, w_hh, bias) in params["lstm"]:
        h = jnp.zeros((B, H), jnp.float32)
        c = jnp.zeros((B, H), jnp.float32)
        outs = []
        for t in range(T):
            g = layer_in[:, t, :] @ w_ih + h @ w_hh + bias
            i_g = jax.nn.sigmoid(g[:, 0 * H:1 * H])
            f_g = jax.nn.sigmoid(g[:, 1 * H:2 * H])
            g_g = jnp.tanh(g[:, 2 * H:3 * H])
            o_g = jax.nn.sigmoid(g[:, 3 * H:4 * H])
            c = f_g * c + i_g * g_g
            h = o_g * jnp.tanh(c)
            outs.append(h)
        layer_in = jnp.stack(outs, axis=1)  # (B, T, H)
    flat = layer_in.reshape(B, -1)
    h1 = jnp.maximum(flat @ params["fc1_w"] + params["fc1_b"], 0.0)
    return h1 @ params["fc2_w"] + params["fc2_b"]


if __name__ == "__main__":
    input_size, hidden_size, num_layers, output_size, seq_length = 16, 32, 2, 4, 8
    batch = 2

    key = jax.random.PRNGKey(0)
    pkey, xkey = jax.random.split(key)
    params = init_params(pkey, input_size, hidden_size, num_layers, output_size, seq_length)
    x = jax.random.normal(xkey, (batch, seq_length, input_size), jnp.float32)

    out = lstm_model_forward(params, x)
    out = jax.block_until_ready(out)

    ref = reference_forward(params, x)
    assert out.shape == (batch, output_size), out.shape
    assert jnp.allclose(out, ref, atol=1e-4, rtol=1e-4), (out, ref)

    print("KERNEL_OK")
</pallas_src>

<mosaic_0001>
module attributes {stable_mosaic.version = 11 : i64} {
  func.func @kernel(%arg0: memref<16x16xf32, #tpu.memory_space<vmem>>, %arg1: memref<16x128xf32, #tpu.memory_space<vmem>>, %arg2: memref<32x128xf32, #tpu.memory_space<vmem>>, %arg3: memref<1x128xf32, #tpu.memory_space<vmem>>, %arg4: memref<64x128xf32, #tpu.memory_space<vmem>>, %arg5: memref<1x128xf32, #tpu.memory_space<vmem>>, %arg6: memref<256x32xf32, #tpu.memory_space<vmem>>, %arg7: memref<1x32xf32, #tpu.memory_space<vmem>>, %arg8: memref<32x4xf32, #tpu.memory_space<vmem>>, %arg9: memref<1x4xf32, #tpu.memory_space<vmem>>, %arg10: memref<2x4xf32, #tpu.memory_space<vmem>>) attributes {dimension_semantics = [], scalar_prefetch = 0 : i64, scratch_operands = 0 : i64, tpu.core_type = #tpu.core_type<tc>} {
    %c0 = arith.constant 0 : index
    %c0_0 = arith.constant 0 : index
    %0 = vector.load %arg0[%c0, %c0_0] : memref<16x16xf32, #tpu.memory_space<vmem>>, vector<16x16xf32>
    %c0_1 = arith.constant 0 : index
    %c0_2 = arith.constant 0 : index
    %1 = vector.load %arg1[%c0_1, %c0_2] : memref<16x128xf32, #tpu.memory_space<vmem>>, vector<16x128xf32>
    %cst = arith.constant dense<0.000000e+00> : vector<16x128xf32>
    %2 = tpu.matmul %0, %1, %cst {dimension_numbers = #tpu.dot_dimension_numbers<[1], [0], [0], [1], [0, 0, 1, 1], [], []>} : vector<16x16xf32>, vector<16x128xf32>, vector<16x128xf32> -> vector<16x128xf32>
    %c0_3 = arith.constant 0 : index
    %c0_4 = arith.constant 0 : index
    %3 = vector.load %arg3[%c0_3, %c0_4] : memref<1x128xf32, #tpu.memory_space<vmem>>, vector<1x128xf32>
    %4 = vector.broadcast %3 : vector<1x128xf32> to vector<16x128xf32>
    %5 = arith.addf %2, %4 : vector<16x128xf32>
    %c0_5 = arith.constant 0 : index
    %c0_6 = arith.constant 0 : index
    %6 = vector.load %arg5[%c0_5, %c0_6] : memref<1x128xf32, #tpu.memory_space<vmem>>, vector<1x128xf32>
    %7 = vector.shape_cast %6 : vector<1x128xf32> to vector<1x128xf32>
    %8 = vector.broadcast %7 : vector<1x128xf32> to vector<2x128xf32>
    %cst_7 = arith.constant 0.000000e+00 : f32
    %9 = vector.broadcast %cst_7 : f32 to vector<2x32xf32>
    %cst_8 = arith.constant 0.000000e+00 : f32
    %10 = vector.broadcast %cst_8 : f32 to vector<2x32xf32>
    %cst_9 = arith.constant 0.000000e+00 : f32
    %11 = vector.broadcast %cst_9 : f32 to vector<2x32xf32>
    %cst_10 = arith.constant 0.000000e+00 : f32
    %12 = vector.broadcast %cst_10 : f32 to vector<2x32xf32>
    %13 = vector.extract_strided_slice %5 {offsets = [0, 0], sizes = [2, 128], strides = [1, 1]} : vector<16x128xf32> to vector<2x128xf32>
    %c0_11 = arith.constant 0 : index
    %c0_12 = arith.constant 0 : index
    %14 = vector.load %arg2[%c0_11, %c0_12] : memref<32x128xf32, #tpu.memory_space<vmem>>, vector<32x128xf32>
    %cst_13 = arith.constant dense<0.000000e+00> : vector<2x128xf32>
    %15 = tpu.matmul %9, %14, %cst_13 {dimension_numbers = #tpu.dot_dimension_numbers<[1], [0], [0], [1], [0, 0, 1, 1], [], []>} : vector<2x32xf32>, vector<32x128xf32>, vector<2x128xf32> -> vector<2x128xf32>
    %16 = arith.addf %13, %15 : vector<2x128xf32>
    %17 = arith.negf %16 : vector<2x128xf32>
    %18 = math.exp %17 : vector<2x128xf32>
    %cst_14 = arith.constant 1.000000e+00 : f32
    %19 = vector.broadcast %cst_14 : f32 to vector<2x128xf32>
    %20 = arith.addf %19, %18 : vector<2x128xf32>
    %21 = arith.divf %19, %20 : vector<2x128xf32>
    %22 = math.tanh %16 : vector<2x128xf32>
    %23 = vector.extract_strided_slice %21 {offsets = [0, 0], sizes = [2, 32], strides = [1, 1]} : vector<2x128xf32> to vector<2x32xf32>
    %24 = vector.extract_strided_slice %21 {offsets = [0, 32], sizes = [2, 32], strides = [1, 1]} : vector<2x128xf32> to vector<2x32xf32>
    %25 = vector.extract_strided_slice %22 {offsets = [0, 64], sizes = [2, 32], strides = [1, 1]} : vector<2x128xf32> to vector<2x32xf32>
    %26 = vector.extract_strided_slice %21 {offsets = [0, 96], sizes = [2, 32], strides = [1, 1]} : vector<2x128xf32> to vector<2x32xf32>
    %27 = arith.mulf %24, %11 : vector<2x32xf32>
    %28 = arith.mulf %23, %25 : vector<2x32xf32>
    %29 = arith.addf %27, %28 : vector<2x32xf32>
    %30 = math.tanh %29 : vector<2x32xf32>
    %31 = arith.mulf %26, %30 : vector<2x32xf32>
    %32 = tpu.concatenate %31, %10 in 1 : vector<2x32xf32>, vector<2x32xf32> -> vector<2x64xf32>
    %c0_15 = arith.constant 0 : index
    %c0_16 = arith.constant 0 : index
    %33 = vector.load %arg4[%c0_15, %c0_16] : memref<64x128xf32, #tpu.memory_space<vmem>>, vector<64x128xf32>
    %cst_17 = arith.constant dense<0.000000e+00> : vector<2x128xf32>
    %34 = tpu.matmul %32, %33, %cst_17 {dimension_numbers = #tpu.dot_dimension_numbers<[1], [0], [0], [1], [0, 0, 1, 1], [], []>} : vector<2x64xf32>, vector<64x128xf32>, vector<2x128xf32> -> vector<2x128xf32>
    %35 = arith.addf %34, %8 : vector<2x128xf32>
    %36 = arith.negf %35 : vector<2x128xf32>
    %37 = math.exp %36 : vector<2x128xf32>
    %cst_18 = arith.constant 1.000000e+00 : f32
    %38 = vector.broadcast %cst_18 : f32 to vector<2x128xf32>
    %39 = arith.addf %38, %37 : vector<2x128xf32>
    %40 = arith.divf %38, %39 : vector<2x128xf32>
    %41 = math.tanh %35 : vector<2x128xf32>
    %42 = vector.extract_strided_slice %40 {offsets = [0, 0], sizes = [2, 32], strides = [1, 1]} : vector<2x128xf32> to vector<2x32xf32>
    %43 = vector.extract_strided_slice %40 {offsets = [0, 32], sizes = [2, 32], strides = [1, 1]} : vector<2x128xf32> to vector<2x32xf32>
    %44 = vector.extract_strided_slice %41 {offsets = [0, 64], sizes = [2, 32], strides = [1, 1]} : vector<2x128xf32> to vector<2x32xf32>
    %45 = vector.extract_strided_slice %40 {offsets = [0, 96], sizes = [2, 32], strides = [1, 1]} : vector<2x128xf32> to vector<2x32xf32>
    %46 = arith.mulf %43, %12 : vector<2x32xf32>
    %47 = arith.mulf %42, %44 : vector<2x32xf32>
    %48 = arith.addf %46, %47 : vector<2x32xf32>
    %49 = math.tanh %48 : vector<2x32xf32>
    %50 = arith.mulf %45, %49 : vector<2x32xf32>
    %51 = vector.extract_strided_slice %5 {offsets = [2, 0], sizes = [2, 128], strides = [1, 1]} : vector<16x128xf32> to vector<2x128xf32>
    %c0_19 = arith.constant 0 : index
    %c0_20 = arith.constant 0 : index
    %52 = vector.load %arg2[%c0_19, %c0_20] : memref<32x128xf32, #tpu.memory_space<vmem>>, vector<32x128xf32>
    %cst_21 = arith.constant dense<0.000000e+00> : vector<2x128xf32>
    %53 = tpu.matmul %31, %52, %cst_21 {dimension_numbers = #tpu.dot_dimension_numbers<[1], [0], [0], [1], [0, 0, 1, 1], [], []>} : vector<2x32xf32>, vector<32x128xf32>, vector<2x128xf32> -> vector<2x128xf32>
    %54 = arith.addf %51, %53 : vector<2x128xf32>
    %55 = arith.negf %54 : vector<2x128xf32>
    %56 = math.exp %55 : vector<2x128xf32>
    %cst_22 = arith.constant 1.000000e+00 : f32
    %57 = vector.broadcast %cst_22 : f32 to vector<2x128xf32>
    %58 = arith.addf %57, %56 : vector<2x128xf32>
    %59 = arith.divf %57, %58 : vector<2x128xf32>
    %60 = math.tanh %54 : vector<2x128xf32>
    %61 = vector.extract_strided_slice %59 {offsets = [0, 0], sizes = [2, 32], strides = [1, 1]} : vector<2x128xf32> to vector<2x32xf32>
    %62 = vector.extract_strided_slice %59 {offsets = [0, 32], sizes = [2, 32], strides = [1, 1]} : vector<2x128xf32> to vector<2x32xf32>
    %63 = vector.extract_strided_slice %60 {offsets = [0, 64], sizes = [2, 32], strides = [1, 1]} : vector<2x128xf32> to vector<2x32xf32>
    %64 = vector.extract_strided_slice %59 {offsets = [0, 96], sizes = [2, 32], strides = [1, 1]} : vector<2x128xf32> to vector<2x32xf32>
    %65 = arith.mulf %62, %29 : vector<2x32xf32>
    %66 = arith.mulf %61, %63 : vector<2x32xf32>
    %67 = arith.addf %65, %66 : vector<2x32xf32>
    %68 = math.tanh %67 : vector<2x32xf32>
    %69 = arith.mulf %64, %68 : vector<2x32xf32>
    %70 = tpu.concatenate %69, %50 in 1 : vector<2x32xf32>, vector<2x32xf32> -> vector<2x64xf32>
    %c0_23 = arith.constant 0 : index
    %c0_24 = arith.constant 0 : index
    %71 = vector.load %arg4[%c0_23, %c0_24] : memref<64x128xf32, #tpu.memory_space<vmem>>, vector<64x128xf32>
    %cst_25 = arith.constant dense<0.000000e+00> : vector<2x128xf32>
    %72 = tpu.matmul %70, %71, %cst_25 {dimension_numbers = #tpu.dot_dimension_numbers<[1], [0], [0], [1], [0, 0, 1, 1], [], []>} : vector<2x64xf32>, vector<64x128xf32>, vector<2x128xf32> -> vector<2x128xf32>
    %73 = arith.addf %72, %8 : vector<2x128xf32>
    %74 = arith.negf %73 : vector<2x128xf32>
    %75 = math.exp %74 : vector<2x128xf32>
    %cst_26 = arith.constant 1.000000e+00 : f32
    %76 = vector.broadcast %cst_26 : f32 to vector<2x128xf32>
    %77 = arith.addf %76, %75 : vector<2x128xf32>
    %78 = arith.divf %76, %77 : vector<2x128xf32>
    %79 = math.tanh %73 : vector<2x128xf32>
    %80 = vector.extract_strided_slice %78 {offsets = [0, 0], sizes = [2, 32], strides = [1, 1]} : vector<2x128xf32> to vector<2x32xf32>
    %81 = vector.extract_strided_slice %78 {offsets = [0, 32], sizes = [2, 32], strides = [1, 1]} : vector<2x128xf32> to vector<2x32xf32>
    %82 = vector.extract_strided_slice %79 {offsets = [0, 64], sizes = [2, 32], strides = [1, 1]} : vector<2x128xf32> to vector<2x32xf32>
    %83 = vector.extract_strided_slice %78 {offsets = [0, 96], sizes = [2, 32], strides = [1, 1]} : vector<2x128xf32> to vector<2x32xf32>
    %84 = arith.mulf %81, %48 : vector<2x32xf32>
    %85 = arith.mulf %80, %82 : vector<2x32xf32>
    %86 = arith.addf %84, %85 : vector<2x32xf32>
    %87 = math.tanh %86 : vector<2x32xf32>
    %88 = arith.mulf %83, %87 : vector<2x32xf32>
    %89 = vector.extract_strided_slice %5 {offsets = [4, 0], sizes = [2, 128], strides = [1, 1]} : vector<16x128xf32> to vector<2x128xf32>
    %c0_27 = arith.constant 0 : index
    %c0_28 = arith.constant 0 : index
    %90 = vector.load %arg2[%c0_27, %c0_28] : memref<32x128xf32, #tpu.memory_space<vmem>>, vector<32x128xf32>
    %cst_29 = arith.constant dense<0.000000e+00> : vector<2x128xf32>
    %91 = tpu.matmul %69, %90, %cst_29 {dimension_numbers = #tpu.dot_dimension_numbers<[1], [0], [0], [1], [0, 0, 1, 1], [], []>} : vector<2x32xf32>, vector<32x128xf32>, vector<2x128xf32> -> vector<2x128xf32>
    %92 = arith.addf %89, %91 : vector<2x128xf32>
    %93 = arith.negf %92 : vector<2x128xf32>
    %94 = math.exp %93 : vector<2x128xf32>
    %cst_30 = arith.constant 1.000000e+00 : f32
    %95 = vector.broadcast %cst_30 : f32 to vector<2x128xf32>
    %96 = arith.addf %95, %94 : vector<2x128xf32>
    %97 = arith.divf %95, %96 : vector<2x128xf32>
    %98 = math.tanh %92 : vector<2x128xf32>
    %99 = vector.extract_strided_slice %97 {offsets = [0, 0], sizes = [2, 32], strides = [1, 1]} : vector<2x128xf32> to vector<2x32xf32>
    %100 = vector.extract_strided_slice %97 {offsets = [0, 32], sizes = [2, 32], strides = [1, 1]} : vector<2x128xf32> to vector<2x32xf32>
    %101 = vector.extract_strided_slice %98 {offsets = [0, 64], sizes = [2, 32], strides = [1, 1]} : vector<2x128xf32> to vector<2x32xf32>
    %102 = vector.extract_strided_slice %97 {offsets = [0, 96], sizes = [2, 32], strides = [1, 1]} : vector<2x128xf32> to vector<2x32xf32>
    %103 = arith.mulf %100, %67 : vector<2x32xf32>
    %104 = arith.mulf %99, %101 : vector<2x32xf32>
    %105 = arith.addf %103, %104 : vector<2x32xf32>
    %106 = math.tanh %105 : vector<2x32xf32>
    %107 = arith.mulf %102, %106 : vector<2x32xf32>
    %108 = tpu.concatenate %107, %88 in 1 : vector<2x32xf32>, vector<2x32xf32> -> vector<2x64xf32>
    %c0_31 = arith.constant 0 : index
    %c0_32 = arith.constant 0 : index
    %109 = vector.load %arg4[%c0_31, %c0_32] : memref<64x128xf32, #tpu.memory_space<vmem>>, vector<64x128xf32>
    %cst_33 = arith.constant dense<0.000000e+00> : vector<2x128xf32>
    %110 = tpu.matmul %108, %109, %cst_33 {dimension_numbers = #tpu.dot_dimension_numbers<[1], [0], [0], [1], [0, 0, 1, 1], [], []>} : vector<2x64xf32>, vector<64x128xf32>, vector<2x128xf32> -> vector<2x128xf32>
    %111 = arith.addf %110, %8 : vector<2x128xf32>
    %112 = arith.negf %111 : vector<2x128xf32>
    %113 = math.exp %112 : vector<2x128xf32>
    %cst_34 = arith.constant 1.000000e+00 : f32
    %114 = vector.broadcast %cst_34 : f32 to vector<2x128xf32>
    %115 = arith.addf %114, %113 : vector<2x128xf32>
    %116 = arith.divf %114, %115 : vector<2x128xf32>
    %117 = math.tanh %111 : vector<2x128xf32>
    %118 = vector.extract_strided_slice %116 {offsets = [0, 0], sizes = [2, 32], strides = [1, 1]} : vector<2x128xf32> to vector<2x32xf32>
    %119 = vector.extract_strided_slice %116 {offsets = [0, 32], sizes = [2, 32], strides = [1, 1]} : vector<2x128xf32> to vector<2x32xf32>
    %120 = vector.extract_strided_slice %117 {offsets = [0, 64], sizes = [2, 32], strides = [1, 1]} : vector<2x128xf32> to vector<2x32xf32>
    %121 = vector.extract_strided_slice %116 {offsets = [0, 96], sizes = [2, 32], strides = [1, 1]} : vector<2x128xf32> to vector<2x32xf32>
    %122 = arith.mulf %119, %86 : vector<2x32xf32>
    %123 = arith.mulf %118, %120 : vector<2x32xf32>
    %124 = arith.addf %122, %123 : vector<2x32xf32>
    %125 = math.tanh %124 : vector<2x32xf32>
    %126 = arith.mulf %121, %125 : vector<2x32xf32>
    %127 = vector.extract_strided_slice %5 {offsets = [6, 0], sizes = [2, 128], strides = [1, 1]} : vector<16x128xf32> to vector<2x128xf32>
    %c0_35 = arith.constant 0 : index
    %c0_36 = arith.constant 0 : index
    %128 = vector.load %arg2[%c0_35, %c0_36] : memref<32x128xf32, #tpu.memory_space<vmem>>, vector<32x128xf32>
    %cst_37 = arith.constant dense<0.000000e+00> : vector<2x128xf32>
    %129 = tpu.matmul %107, %128, %cst_37 {dimension_numbers = #tpu.dot_dimension_numbers<[1], [0], [0], [1], [0, 0, 1, 1], [], []>} : vector<2x32xf32>, vector<32x128xf32>, vector<2x128xf32> -> vector<2x128xf32>
    %130 = arith.addf %127, %129 : vector<2x128xf32>
    %131 = arith.negf %130 : vector<2x128xf32>
    %132 = math.exp %131 : vector<2x128xf32>
    %cst_38 = arith.constant 1.000000e+00 : f32
    %133 = vector.broadcast %cst_38 : f32 to vector<2x128xf32>
    %134 = arith.addf %133, %132 : vector<2x128xf32>
    %135 = arith.divf %133, %134 : vector<2x128xf32>
    %136 = math.tanh %130 : vector<2x128xf32>
    %137 = vector.extract_strided_slice %135 {offsets = [0, 0], sizes = [2, 32], strides = [1, 1]} : vector<2x128xf32> to vector<2x32xf32>
    %138 = vector.extract_strided_slice %135 {offsets = [0, 32], sizes = [2, 32], strides = [1, 1]} : vector<2x128xf32> to vector<2x32xf32>
    %139 = vector.extract_strided_slice %136 {offsets = [0, 64], sizes = [2, 32], strides = [1, 1]} : vector<2x128xf32> to vector<2x32xf32>
    %140 = vector.extract_strided_slice %135 {offsets = [0, 96], sizes = [2, 32], strides = [1, 1]} : vector<2x128xf32> to vector<2x32xf32>
    %141 = arith.mulf %138, %105 : vector<2x32xf32>
    %142 = arith.mulf %137, %139 : vector<2x32xf32>
    %143 = arith.addf %141, %142 : vector<2x32xf32>
    %144 = math.tanh %143 : vector<2x32xf32>
    %145 = arith.mulf %140, %144 : vector<2x32xf32>
    %146 = tpu.concatenate %145, %126 in 1 : vector<2x32xf32>, vector<2x32xf32> -> vector<2x64xf32>
    %c0_39 = arith.constant 0 : index
    %c0_40 = arith.constant 0 : index
    %147 = vector.load %arg4[%c0_39, %c0_40] : memref<64x128xf32, #tpu.memory_space<vmem>>, vector<64x128xf32>
    %cst_41 = arith.constant dense<0.000000e+00> : vector<2x128xf32>
    %148 = tpu.matmul %146, %147, %cst_41 {dimension_numbers = #tpu.dot_dimension_numbers<[1], [0], [0], [1], [0, 0, 1, 1], [], []>} : vector<2x64xf32>, vector<64x128xf32>, vector<2x128xf32> -> vector<2x128xf32>
    %149 = arith.addf %148, %8 : vector<2x128xf32>
    %150 = arith.negf %149 : vector<2x128xf32>
    %151 = math.exp %150 : vector<2x128xf32>
    %cst_42 = arith.constant 1.000000e+00 : f32
    %152 = vector.broadcast %cst_42 : f32 to vector<2x128xf32>
    %153 = arith.addf %152, %151 : vector<2x128xf32>
    %154 = arith.divf %152, %153 : vector<2x128xf32>
    %155 = math.tanh %149 : vector<2x128xf32>
    %156 = vector.extract_strided_slice %154 {offsets = [0, 0], sizes = [2, 32], strides = [1, 1]} : vector<2x128xf32> to vector<2x32xf32>
    %157 = vector.extract_strided_slice %154 {offsets = [0, 32], sizes = [2, 32], strides = [1, 1]} : vector<2x128xf32> to vector<2x32xf32>
    %158 = vector.extract_strided_slice %155 {offsets = [0, 64], sizes = [2, 32], strides = [1, 1]} : vector<2x128xf32> to vector<2x32xf32>
    %159 = vector.extract_strided_slice %154 {offsets = [0, 96], sizes = [2, 32], strides = [1, 1]} : vector<2x128xf32> to vector<2x32xf32>
    %160 = arith.mulf %157, %124 : vector<2x32xf32>
    %161 = arith.mulf %156, %158 : vector<2x32xf32>
    %162 = arith.addf %160, %161 : vector<2x32xf32>
    %163 = math.tanh %162 : vector<2x32xf32>
    %164 = arith.mulf %159, %163 : vector<2x32xf32>
    %165 = vector.extract_strided_slice %5 {offsets = [8, 0], sizes = [2, 128], strides = [1, 1]} : vector<16x128xf32> to vector<2x128xf32>
    %c0_43 = arith.constant 0 : index
    %c0_44 = arith.constant 0 : index
    %166 = vector.load %arg2[%c0_43, %c0_44] : memref<32x128xf32, #tpu.memory_space<vmem>>, vector<32x128xf32>
    %cst_45 = arith.constant dense<0.000000e+00> : vector<2x128xf32>
    %167 = tpu.matmul %145, %166, %cst_45 {dimension_numbers = #tpu.dot_dimension_numbers<[1], [0], [0], [1], [0, 0, 1, 1], [], []>} : vector<2x32xf32>, vector<32x128xf32>, vector<2x128xf32> -> vector<2x128xf32>
    %168 = arith.addf %165, %167 : vector<2x128xf32>
    %169 = arith.negf %168 : vector<2x128xf32>
    %170 = math.exp %169 : vector<2x128xf32>
    %cst_46 = arith.constant 1.000000e+00 : f32
    %171 = vector.broadcast %cst_46 : f32 to vector<2x128xf32>
    %172 = arith.addf %171, %170 : vector<2x128xf32>
    %173 = arith.divf %171, %172 : vector<2x128xf32>
    %174 = math.tanh %168 : vector<2x128xf32>
    %175 = vector.extract_strided_slice %173 {offsets = [0, 0], sizes = [2, 32], strides = [1, 1]} : vector<2x128xf32> to vector<2x32xf32>
    %176 = vector.extract_strided_slice %173 {offsets = [0, 32], sizes = [2, 32], strides = [1, 1]} : vector<2x128xf32> to vector<2x32xf32>
    %177 = vector.extract_strided_slice %174 {offsets = [0, 64], sizes = [2, 32], strides = [1, 1]} : vector<2x128xf32> to vector<2x32xf32>
    %178 = vector.extract_strided_slice %173 {offsets = [0, 96], sizes = [2, 32], strides = [1, 1]} : vector<2x128xf32> to vector<2x32xf32>
    %179 = arith.mulf %176, %143 : vector<2x32xf32>
    %180 = arith.mulf %175, %177 : vector<2x32xf32>
    %181 = arith.addf %179, %180 : vector<2x32xf32>
    %182 = math.tanh %181 : vector<2x32xf32>
    %183 = arith.mulf %178, %182 : vector<2x32xf32>
    %184 = tpu.concatenate %183, %164 in 1 : vector<2x32xf32>, vector<2x32xf32> -> vector<2x64xf32>
    %c0_47 = arith.constant 0 : index
    %c0_48 = arith.constant 0 : index
    %185 = vector.load %arg4[%c0_47, %c0_48] : memref<64x128xf32, #tpu.memory_space<vmem>>, vector<64x128xf32>
    %cst_49 = arith.constant dense<0.000000e+00> : vector<2x128xf32>
    %186 = tpu.matmul %184, %185, %cst_49 {dimension_numbers = #tpu.dot_dimension_numbers<[1], [0], [0], [1], [0, 0, 1, 1], [], []>} : vector<2x64xf32>, vector<64x128xf32>, vector<2x128xf32> -> vector<2x128xf32>
    %187 = arith.addf %186, %8 : vector<2x128xf32>
    %188 = arith.negf %187 : vector<2x128xf32>
    %189 = math.exp %188 : vector<2x128xf32>
    %cst_50 = arith.constant 1.000000e+00 : f32
    %190 = vector.broadcast %cst_50 : f32 to vector<2x128xf32>
    %191 = arith.addf %190, %189 : vector<2x128xf32>
    %192 = arith.divf %190, %191 : vector<2x128xf32>
    %193 = math.tanh %187 : vector<2x128xf32>
    %194 = vector.extract_strided_slice %192 {offsets = [0, 0], sizes = [2, 32], strides = [1, 1]} : vector<2x128xf32> to vector<2x32xf32>
    %195 = vector.extract_strided_slice %192 {offsets = [0, 32], sizes = [2, 32], strides = [1, 1]} : vector<2x128xf32> to vector<2x32xf32>
    %196 = vector.extract_strided_slice %193 {offsets = [0, 64], sizes = [2, 32], strides = [1, 1]} : vector<2x128xf32> to vector<2x32xf32>
    %197 = vector.extract_strided_slice %192 {offsets = [0, 96], sizes = [2, 32], strides = [1, 1]} : vector<2x128xf32> to vector<2x32xf32>
    %198 = arith.mulf %195, %162 : vector<2x32xf32>
    %199 = arith.mulf %194, %196 : vector<2x32xf32>
    %200 = arith.addf %198, %199 : vector<2x32xf32>
    %201 = math.tanh %200 : vector<2x32xf32>
    %202 = arith.mulf %197, %201 : vector<2x32xf32>
    %203 = vector.extract_strided_slice %5 {offsets = [10, 0], sizes = [2, 128], strides = [1, 1]} : vector<16x128xf32> to vector<2x128xf32>
    %c0_51 = arith.constant 0 : index
    %c0_52 = arith.constant 0 : index
    %204 = vector.load %arg2[%c0_51, %c0_52] : memref<32x128xf32, #tpu.memory_space<vmem>>, vector<32x128xf32>
    %cst_53 = arith.constant dense<0.000000e+00> : vector<2x128xf32>
    %205 = tpu.matmul %183, %204, %cst_53 {dimension_numbers = #tpu.dot_dimension_numbers<[1], [0], [0], [1], [0, 0, 1, 1], [], []>} : vector<2x32xf32>, vector<32x128xf32>, vector<2x128xf32> -> vector<2x128xf32>
    %206 = arith.addf %203, %205 : vector<2x128xf32>
    %207 = arith.negf %206 : vector<2x128xf32>
    %208 = math.exp %207 : vector<2x128xf32>
    %cst_54 = arith.constant 1.000000e+00 : f32
    %209 = vector.broadcast %cst_54 : f32 to vector<2x128xf32>
    %210 = arith.addf %209, %208 : vector<2x128xf32>
    %211 = arith.divf %209, %210 : vector<2x128xf32>
    %212 = math.tanh %206 : vector<2x128xf32>
    %213 = vector.extract_strided_slice %211 {offsets = [0, 0], sizes = [2, 32], strides = [1, 1]} : vector<2x128xf32> to vector<2x32xf32>
    %214 = vector.extract_strided_slice %211 {offsets = [0, 32], sizes = [2, 32], strides = [1, 1]} : vector<2x128xf32> to vector<2x32xf32>
    %215 = vector.extract_strided_slice %212 {offsets = [0, 64], sizes = [2, 32], strides = [1, 1]} : vector<2x128xf32> to vector<2x32xf32>
    %216 = vector.extract_strided_slice %211 {offsets = [0, 96], sizes = [2, 32], strides = [1, 1]} : vector<2x128xf32> to vector<2x32xf32>
    %217 = arith.mulf %214, %181 : vector<2x32xf32>
    %218 = arith.mulf %213, %215 : vector<2x32xf32>
    %219 = arith.addf %217, %218 : vector<2x32xf32>
    %220 = math.tanh %219 : vector<2x32xf32>
    %221 = arith.mulf %216, %220 : vector<2x32xf32>
    %222 = tpu.concatenate %221, %202 in 1 : vector<2x32xf32>, vector<2x32xf32> -> vector<2x64xf32>
    %c0_55 = arith.constant 0 : index
    %c0_56 = arith.constant 0 : index
    %223 = vector.load %arg4[%c0_55, %c0_56] : memref<64x128xf32, #tpu.memory_space<vmem>>, vector<64x128xf32>
    %cst_57 = arith.constant dense<0.000000e+00> : vector<2x128xf32>
    %224 = tpu.matmul %222, %223, %cst_57 {dimension_numbers = #tpu.dot_dimension_numbers<[1], [0], [0], [1], [0, 0, 1, 1], [], []>} : vector<2x64xf32>, vector<64x128xf32>, vector<2x128xf32> -> vector<2x128xf32>
    %225 = arith.addf %224, %8 : vector<2x128xf32>
    %226 = arith.negf %225 : vector<2x128xf32>
    %227 = math.exp %226 : vector<2x128xf32>
    %cst_58 = arith.constant 1.000000e+00 : f32
    %228 = vector.broadcast %cst_58 : f32 to vector<2x128xf32>
    %229 = arith.addf %228, %227 : vector<2x128xf32>
    %230 = arith.divf %228, %229 : vector<2x128xf32>
    %231 = math.tanh %225 : vector<2x128xf32>
    %232 = vector.extract_strided_slice %230 {offsets = [0, 0], sizes = [2, 32], strides = [1, 1]} : vector<2x128xf32> to vector<2x32xf32>
    %233 = vector.extract_strided_slice %230 {offsets = [0, 32], sizes = [2, 32], strides = [1, 1]} : vector<2x128xf32> to vector<2x32xf32>
    %234 = vector.extract_strided_slice %231 {offsets = [0, 64], sizes = [2, 32], strides = [1, 1]} : vector<2x128xf32> to vector<2x32xf32>
    %235 = vector.extract_strided_slice %230 {offsets = [0, 96], sizes = [2, 32], strides = [1, 1]} : vector<2x128xf32> to vector<2x32xf32>
    %236 = arith.mulf %233, %200 : vector<2x32xf32>
    %237 = arith.mulf %232, %234 : vector<2x32xf32>
    %238 = arith.addf %236, %237 : vector<2x32xf32>
    %239 = math.tanh %238 : vector<2x32xf32>
    %240 = arith.mulf %235, %239 : vector<2x32xf32>
    %241 = vector.extract_strided_slice %5 {offsets = [12, 0], sizes = [2, 128], strides = [1, 1]} : vector<16x128xf32> to vector<2x128xf32>
    %c0_59 = arith.constant 0 : index
    %c0_60 = arith.constant 0 : index
    %242 = vector.load %arg2[%c0_59, %c0_60] : memref<32x128xf32, #tpu.memory_space<vmem>>, vector<32x128xf32>
    %cst_61 = arith.constant dense<0.000000e+00> : vector<2x128xf32>
    %243 = tpu.matmul %221, %242, %cst_61 {dimension_numbers = #tpu.dot_dimension_numbers<[1], [0], [0], [1], [0, 0, 1, 1], [], []>} : vector<2x32xf32>, vector<32x128xf32>, vector<2x128xf32> -> vector<2x128xf32>
    %244 = arith.addf %241, %243 : vector<2x128xf32>
    %245 = arith.negf %244 : vector<2x128xf32>
    %246 = math.exp %245 : vector<2x128xf32>
    %cst_62 = arith.constant 1.000000e+00 : f32
    %247 = vector.broadcast %cst_62 : f32 to vector<2x128xf32>
    %248 = arith.addf %247, %246 : vector<2x128xf32>
    %249 = arith.divf %247, %248 : vector<2x128xf32>
    %250 = math.tanh %244 : vector<2x128xf32>
    %251 = vector.extract_strided_slice %249 {offsets = [0, 0], sizes = [2, 32], strides = [1, 1]} : vector<2x128xf32> to vector<2x32xf32>
    %252 = vector.extract_strided_slice %249 {offsets = [0, 32], sizes = [2, 32], strides = [1, 1]} : vector<2x128xf32> to vector<2x32xf32>
    %253 = vector.extract_strided_slice %250 {offsets = [0, 64], sizes = [2, 32], strides = [1, 1]} : vector<2x128xf32> to vector<2x32xf32>
    %254 = vector.extract_strided_slice %249 {offsets = [0, 96], sizes = [2, 32], strides = [1, 1]} : vector<2x128xf32> to vector<2x32xf32>
    %255 = arith.mulf %252, %219 : vector<2x32xf32>
    %256 = arith.mulf %251, %253 : vector<2x32xf32>
    %257 = arith.addf %255, %256 : vector<2x32xf32>
    %258 = math.tanh %257 : vector<2x32xf32>
    %259 = arith.mulf %254, %258 : vector<2x32xf32>
    %260 = tpu.concatenate %259, %240 in 1 : vector<2x32xf32>, vector<2x32xf32> -> vector<2x64xf32>
    %c0_63 = arith.constant 0 : index
    %c0_64 = arith.constant 0 : index
    %261 = vector.load %arg4[%c0_63, %c0_64] : memref<64x128xf32, #tpu.memory_space<vmem>>, vector<64x128xf32>
    %cst_65 = arith.constant dense<0.000000e+00> : vector<2x128xf32>
    %262 = tpu.matmul %260, %261, %cst_65 {dimension_numbers = #tpu.dot_dimension_numbers<[1], [0], [0], [1], [0, 0, 1, 1], [], []>} : vector<2x64xf32>, vector<64x128xf32>, vector<2x128xf32> -> vector<2x128xf32>
    %263 = arith.addf %262, %8 : vector<2x128xf32>
    %264 = arith.negf %263 : vector<2x128xf32>
    %265 = math.exp %264 : vector<2x128xf32>
    %cst_66 = arith.constant 1.000000e+00 : f32
    %266 = vector.broadcast %cst_66 : f32 to vector<2x128xf32>
    %267 = arith.addf %266, %265 : vector<2x128xf32>
    %268 = arith.divf %266, %267 : vector<2x128xf32>
    %269 = math.tanh %263 : vector<2x128xf32>
    %270 = vector.extract_strided_slice %268 {offsets = [0, 0], sizes = [2, 32], strides = [1, 1]} : vector<2x128xf32> to vector<2x32xf32>
    %271 = vector.extract_strided_slice %268 {offsets = [0, 32], sizes = [2, 32], strides = [1, 1]} : vector<2x128xf32> to vector<2x32xf32>
    %272 = vector.extract_strided_slice %269 {offsets = [0, 64], sizes = [2, 32], strides = [1, 1]} : vector<2x128xf32> to vector<2x32xf32>
    %273 = vector.extract_strided_slice %268 {offsets = [0, 96], sizes = [2, 32], strides = [1, 1]} : vector<2x128xf32> to vector<2x32xf32>
    %274 = arith.mulf %271, %238 : vector<2x32xf32>
    %275 = arith.mulf %270, %272 : vector<2x32xf32>
    %276 = arith.addf %274, %275 : vector<2x32xf32>
    %277 = math.tanh %276 : vector<2x32xf32>
    %278 = arith.mulf %273, %277 : vector<2x32xf32>
    %279 = vector.extract_strided_slice %5 {offsets = [14, 0], sizes = [2, 128], strides = [1, 1]} : vector<16x128xf32> to vector<2x128xf32>
    %c0_67 = arith.constant 0 : index
    %c0_68 = arith.constant 0 : index
    %280 = vector.load %arg2[%c0_67, %c0_68] : memref<32x128xf32, #tpu.memory_space<vmem>>, vector<32x128xf32>
    %cst_69 = arith.constant dense<0.000000e+00> : vector<2x128xf32>
    %281 = tpu.matmul %259, %280, %cst_69 {dimension_numbers = #tpu.dot_dimension_numbers<[1], [0], [0], [1], [0, 0, 1, 1], [], []>} : vector<2x32xf32>, vector<32x128xf32>, vector<2x128xf32> -> vector<2x128xf32>
    %282 = arith.addf %279, %281 : vector<2x128xf32>
    %283 = arith.negf %282 : vector<2x128xf32>
    %284 = math.exp %283 : vector<2x128xf32>
    %cst_70 = arith.constant 1.000000e+00 : f32
    %285 = vector.broadcast %cst_70 : f32 to vector<2x128xf32>
    %286 = arith.addf %285, %284 : vector<2x128xf32>
    %287 = arith.divf %285, %286 : vector<2x128xf32>
    %288 = math.tanh %282 : vector<2x128xf32>
    %289 = vector.extract_strided_slice %287 {offsets = [0, 0], sizes = [2, 32], strides = [1, 1]} : vector<2x128xf32> to vector<2x32xf32>
    %290 = vector.extract_strided_slice %287 {offsets = [0, 32], sizes = [2, 32], strides = [1, 1]} : vector<2x128xf32> to vector<2x32xf32>
    %291 = vector.extract_strided_slice %288 {offsets = [0, 64], sizes = [2, 32], strides = [1, 1]} : vector<2x128xf32> to vector<2x32xf32>
    %292 = vector.extract_strided_slice %287 {offsets = [0, 96], sizes = [2, 32], strides = [1, 1]} : vector<2x128xf32> to vector<2x32xf32>
    %293 = arith.mulf %290, %257 : vector<2x32xf32>
    %294 = arith.mulf %289, %291 : vector<2x32xf32>
    %295 = arith.addf %293, %294 : vector<2x32xf32>
    %296 = math.tanh %295 : vector<2x32xf32>
    %297 = arith.mulf %292, %296 : vector<2x32xf32>
    %298 = tpu.concatenate %297, %278 in 1 : vector<2x32xf32>, vector<2x32xf32> -> vector<2x64xf32>
    %c0_71 = arith.constant 0 : index
    %c0_72 = arith.constant 0 : index
    %299 = vector.load %arg4[%c0_71, %c0_72] : memref<64x128xf32, #tpu.memory_space<vmem>>, vector<64x128xf32>
    %cst_73 = arith.constant dense<0.000000e+00> : vector<2x128xf32>
    %300 = tpu.matmul %298, %299, %cst_73 {dimension_numbers = #tpu.dot_dimension_numbers<[1], [0], [0], [1], [0, 0, 1, 1], [], []>} : vector<2x64xf32>, vector<64x128xf32>, vector<2x128xf32> -> vector<2x128xf32>
    %301 = arith.addf %300, %8 : vector<2x128xf32>
    %302 = arith.negf %301 : vector<2x128xf32>
    %303 = math.exp %302 : vector<2x128xf32>
    %cst_74 = arith.constant 1.000000e+00 : f32
    %304 = vector.broadcast %cst_74 : f32 to vector<2x128xf32>
    %305 = arith.addf %304, %303 : vector<2x128xf32>
    %306 = arith.divf %304, %305 : vector<2x128xf32>
    %307 = math.tanh %301 : vector<2x128xf32>
    %308 = vector.extract_strided_slice %306 {offsets = [0, 0], sizes = [2, 32], strides = [1, 1]} : vector<2x128xf32> to vector<2x32xf32>
    %309 = vector.extract_strided_slice %306 {offsets = [0, 32], sizes = [2, 32], strides = [1, 1]} : vector<2x128xf32> to vector<2x32xf32>
    %310 = vector.extract_strided_slice %307 {offsets = [0, 64], sizes = [2, 32], strides = [1, 1]} : vector<2x128xf32> to vector<2x32xf32>
    %311 = vector.extract_strided_slice %306 {offsets = [0, 96], sizes = [2, 32], strides = [1, 1]} : vector<2x128xf32> to vector<2x32xf32>
    %312 = arith.mulf %309, %276 : vector<2x32xf32>
    %313 = arith.mulf %308, %310 : vector<2x32xf32>
    %314 = arith.addf %312, %313 : vector<2x32xf32>
    %315 = math.tanh %314 : vector<2x32xf32>
    %316 = arith.mulf %311, %315 : vector<2x32xf32>
    %317 = tpu.concatenate %50, %88, %126, %164, %202, %240, %278, %316 in 1 : vector<2x32xf32>, vector<2x32xf32>, vector<2x32xf32>, vector<2x32xf32>, vector<2x32xf32>, vector<2x32xf32>, vector<2x32xf32>, vector<2x32xf32> -> vector<2x256xf32>
    %c0_75 = arith.constant 0 : index
    %c0_76 = arith.constant 0 : index
    %318 = vector.load %arg6[%c0_75, %c0_76] : memref<256x32xf32, #tpu.memory_space<vmem>>, vector<256x32xf32>
    %cst_77 = arith.constant dense<0.000000e+00> : vector<2x32xf32>
    %319 = tpu.matmul %317, %318, %cst_77 {dimension_numbers = #tpu.dot_dimension_numbers<[1], [0], [0], [1], [0, 0, 1, 1], [], []>} : vector<2x256xf32>, vector<256x32xf32>, vector<2x32xf32> -> vector<2x32xf32>
    %c0_78 = arith.constant 0 : index
    %c0_79 = arith.constant 0 : index
    %320 = vector.load %arg7[%c0_78, %c0_79] : memref<1x32xf32, #tpu.memory_space<vmem>>, vector<1x32xf32>
    %321 = vector.broadcast %320 : vector<1x32xf32> to vector<2x32xf32>
    %322 = arith.addf %319, %321 : vector<2x32xf32>
    %cst_80 = arith.constant 0.000000e+00 : f32
    %323 = vector.broadcast %cst_80 : f32 to vector<2x32xf32>
    %324 = arith.maximumf %322, %323 : vector<2x32xf32>
    %c0_81 = arith.constant 0 : index
    %c0_82 = arith.constant 0 : index
    %325 = vector.load %arg8[%c0_81, %c0_82] : memref<32x4xf32, #tpu.memory_space<vmem>>, vector<32x4xf32>
    %cst_83 = arith.constant dense<0.000000e+00> : vector<2x4xf32>
    %326 = tpu.matmul %324, %325, %cst_83 {dimension_numbers = #tpu.dot_dimension_numbers<[1], [0], [0], [1], [0, 0, 1, 1], [], []>} : vector<2x32xf32>, vector<32x4xf32>, vector<2x4xf32> -> vector<2x4xf32>
    %c0_84 = arith.constant 0 : index
    %c0_85 = arith.constant 0 : index
    %327 = vector.load %arg9[%c0_84, %c0_85] : memref<1x4xf32, #tpu.memory_space<vmem>>, vector<1x4xf32>
    %328 = vector.broadcast %327 : vector<1x4xf32> to vector<2x4xf32>
    %329 = arith.addf %326, %328 : vector<2x4xf32>
    %c0_86 = arith.constant 0 : index
    %c0_87 = arith.constant 0 : index
    %330 = vector.load %arg10[%c0_86, %c0_87] : memref<2x4xf32, #tpu.memory_space<vmem>>, vector<2x4xf32>
    tpu.vector_store %arg10[%c0_86, %c0_87], %329 {strides = array<i32>} : memref<2x4xf32, #tpu.memory_space<vmem>>, vector<2x4xf32>,
    return
  }
}

</mosaic_0001>

<bundles_post_ra>
// kernel: lstm_model_forward.1
= control target key start
LH: loop header
LB: loop body
LE: loop exit
PB: predicated region body
PF: predicated region fallthrough
CT: control target
= control target key end

     0   :  { %vm47_vm0 = vcmask 130048   ;;  %v2884_v6 = vmov 0.0|0.0   ;;  %vm2885_vm1 = vmmov 0   ;;  %v2886_v7 = vmov 0.0   ;;  %s3478_s0 = inlined_call_operand.vmem [shape: f32[16,16], index: 0, kind: input, shape index: {}]   ;;  %s3479_s1 = inlined_call_operand.vmem [shape: f32[16,128], index: 1, kind: input, shape index: {}]   ;;  %s3480_s2 = inlined_call_operand.vmem [shape: f32[32,128], index: 2, kind: input, shape index: {}]   ;;  %s3481_s3 = inlined_call_operand.vmem [shape: f32[1,128], index: 3, kind: input, shape index: {}]   ;;  %s3482_s4 = inlined_call_operand.vmem [shape: f32[64,128], index: 4, kind: input, shape index: {}]   ;;  %s3483_s5 = inlined_call_operand.vmem [shape: f32[1,128], index: 5, kind: input, shape index: {}]   ;;  %s3484_s6 = inlined_call_operand.vmem [shape: f32[256,32], index: 6, kind: input, shape index: {}]   ;;  %s3485_s7 = inlined_call_operand.vmem [shape: f32[1,32], index: 7, kind: input, shape index: {}]   ;;  %s3486_s8 = inlined_call_operand.vmem [shape: f32[32,4], index: 8, kind: input, shape index: {}]   ;;  %s3487_s9 = inlined_call_operand.vmem [shape: f32[1,4], index: 9, kind: input, shape index: {}]   ;;  %s3488_s10 = inlined_call_operand.hbm [shape: f32[2,4], index: 10, kind: output, shape index: {}]  }
   0x1   :  { %v38_v0 = vld [vmem:[%s3479_s1] sm:$0xff]  ;;  %v39_v1 = vld [vmem:[%s3479_s1 + $0x8] sm:$0xff]  ;;  %2534 = vmatprep.subr.bf16.mxu0 %v2884_v6  ;;  %2300 = vmatprep.mubr.msk.f32.mxu0 %vm2885_vm1, %v2886_v7 }
   0x2   :  { %v36_v2 = vld [vmem:[%s3478_s0] sm:$0xff]  ;;  %v2524_v3 = vpack.c.bf16 %v39_v1, %v38_v0  ;;  %v137_v5 = vld [vmem:[%s3480_s2 + $0x8] sm:$0xff] }
   0x3   :  { %2270 = vmatprep.mubr.msk.f32.mxu1 %vm47_vm0, %v36_v2  ;;  %v136_v4 = vld [vmem:[%s3480_s2] sm:$0xff] }
   0x4   :  { %15 = vsyncpa [#allocation3], 0  ;;  %2525 = vmatprep.subr.bf16.mxu1 %v2524_v3  ;;  %v37_v8 = vld [vmem:[%s3478_s0 + $0x8] sm:$0xff]  ;;  %v2968_v9 = vpack.c.bf16 %v137_v5, %v136_v4  ;;  %v138_v10 = vld [vmem:[%s3480_s2 + $0x10] sm:$0xff]  ;;  %s2887_s28 = smov 64   ;;  %vm140_vm2 = vcmask 261120  }
   0x5   :  { %2527 = vmatpush3.bf16.msra.mxu1 %v2524_v3  ;;  %v139_v11 = vld [vmem:[%s3480_s2 + $0x18] sm:$0xff]  ;;  %v2072_v13 = vld [vmem:[%s3481_s3] ss:$0 sm:$0xff]  ;;  %s2888_s3 = smov 32   ;;  %v245_v32 = vld [vmem:[%s3482_s4 + $0x8] sm:$0xff]  ;;  %vm252_vm3 = vcmask 523264  }
   0x6   :  { %2528 = vmatprep.subr.bf16.mxu1 %v2884_v6  ;;  %v2979_v12 = vpack.c.bf16 %v139_v11, %v138_v10  ;;  %v244_v31 = vld [vmem:[%s3482_s4] sm:$0xff]  ;;  %v246_v33 = vld [vmem:[%s3482_s4 + $0x10] sm:$0xff]  ;;  %v247_v35 = vld [vmem:[%s3482_s4 + $0x18] sm:$0xff]  ;;  %s2889_s22 = smov 96   ;;  %vm1857_vm4 = vcmask 785408   ;;  %vm2056_vm5 = vcmask 25600  }
   0x7   :  { %v3015_v34 = vpack.c.bf16 %v245_v32, %v244_v31  ;;  %v3021_v36 = vpack.c.bf16 %v247_v35, %v246_v33  ;;  %v248_v37 = vld [vmem:[%s3482_s4 + $0x20] sm:$0xff]  ;;  %v249_v38 = vld [vmem:[%s3482_s4 + $0x28] sm:$0xff]  ;;  %v250_v40 = vld [vmem:[%s3482_s4 + $0x30] sm:$0xff] }
   0x8   :  { %2271 = vmatmul.mubr.msk.f32.vlgmr.msra.gmra.mrb[0].mxu1 %vm47_vm0, %v37_v8  ;;  %v3031_v39 = vpack.c.bf16 %v249_v38, %v248_v37  ;;  %v251_v41 = vld [vmem:[%s3482_s4 + $0x38] sm:$0xff]  ;;  %v3070_v48 = vld [vmem:[%s3483_s5] ss:$0 sm:$0xff]  ;;  %s2890_s5 = smov [#allocation2]  }
   0x9   :  { %2530 = vmatpush3.bf16.msra.mxu1 %v2968_v9  ;;  %2281 = vmatprep.mubr.msk.f32.mxu1 %vm2885_vm1, %v2886_v7  ;;  %v3042_v43 = vpack.c.bf16 %v251_v41, %v250_v40  ;;  %s2064_s25 = sshll.u32 %s2890_s5, 4  ;;  %s2065_s25 = int_to_ptr.vmem [resolvable:$true] %s2064_s25 }
   0xa   :  { %2531 = vmatprep.subr.bf16.mxu1 %v2884_v6  ;;  %2536 = vmatpush3.bf16.msra.mxu0 %v3015_v34  ;;  %p2865_p1 = scmp.lt.s32.totalorder %s2065_s25, %s2065_s25 }
   0xb   :  { %2537 = vmatprep.subr.bf16.mxu0 %v2884_v6 }
   0xd   :  { %2533 = vmatpush3.bf16.msra.mxu1 %v2979_v12 }
   0xe   :  { %2546 = vmatprep.subr.bf16.mxu1 %v2884_v6  ;;  %2539 = vmatpush3.bf16.msra.mxu0 %v3021_v36 }
   0xf   :  { %2540 = vmatprep.subr.bf16.mxu0 %v2884_v6 }
  0x10   :  { %2282 = vmatmul.mubr.f32.vlgmr.msra.gmra.mrb[2].mxu1 %v2886_v7 }
  0x11   :  { %2548 = vmatpush3.bf16.msra.mxu1 %v2968_v9  ;;  %2311 = vmatprep.mubr.msk.f32.mxu1 %vm2885_vm1, %v2886_v7 }
  0x12   :  { %2549 = vmatprep.subr.bf16.mxu1 %v2884_v6  ;;  %2542 = vmatpush3.bf16.msra.mxu0 %v3031_v39 }
  0x13   :  { %2543 = vmatprep.subr.bf16.mxu0 %v2884_v6 }
  0x15   :  { %2551 = vmatpush3.bf16.msra.mxu1 %v2979_v12 }
  0x16   :  { %2552 = vmatprep.subr.bf16.mxu1 %v2884_v6  ;;  %2545 = vmatpush3.bf16.msra.mxu0 %v3042_v43 }
  0x17   :  { %2564 = vmatprep.subr.bf16.mxu0 %v2884_v6 }
  0xdb   :  { %v2272_v14 = vpop.f32.mrb[0].mxu1 }
  0xdc   :  { %v2996_v15 = vadd.f32 %v2272_v14, %v2072_v13  ;;  %v120_v16 = vpop.f32.mrb[1].mxu1 }
  0xdd   :  { %v2998_v17 = vadd.f32 %v2072_v13, %v120_v16 }
  0xe3   :  { %v210_v18 = vpop.f32.mrb[2].mxu1 }
  0xe4   :  { %v214_v19 = vadd.f32 %v210_v18, %v2998_v17  ;;  %v2283_v20 = vpop.f32.mrb[3].mxu1 }
  0xe6   :  { %2732 = vtanh.f32 %v214_v19  ;;  %v2076_v22 = vmul.f32 -1.442695, %v214_v19 }
  0xe8   :  { %2734 = vpow2.f32 %v2076_v22 }
  0xf0   :  { %v2733_v21 = vpop.eup %2732 }
  0xf1   :  { %224 = vrot.lane.b32.xlu0 %v2733_v21, %s2887_s28 }
  0xf2   :  { %v2735_v23 = vpop.eup %2734 }
  0xf3   :  { %v218_v24 = vadd.f32 1.0, %v2735_v23 }
  0xf5   :  { %2736 = vrcp.f32 %v218_v24 }
  0xff   :  { %v2737_v25 = vpop.eup %2736 }
 0x100   :  { %v222_v28 = vmul.f32 0.0, %v2737_v25 }
 0x163   :  { %v225_v26 = vpop.permute.xlu0 %224 }
 0x164   :  { %v227_v27 = vmul.f32 %v2737_v25, %v225_v26 }
 0x166   :  { %229 = vrot.lane.b32.xlu0 %v227_v27, %s2888_s3 }
 0x1d8   :  { %v230_v29 = vpop.permute.xlu0 %229 }
 0x1d9   :  { %v3003_v30 = vadd.f32 %v230_v29, %v222_v28 }
 0x1db   :  { %2738 = vtanh.f32 %v3003_v30  ;;  %v434_v8 = vrot.slane %v3003_v30, 6 }
 0x1e5   :  { %v2739_v42 = vpop.eup %2738 }
 0x1e6   :  { %235 = vrot.lane.b32.xlu1 %v2739_v42, %s2887_s28 }
 0x258   :  { %v236_v44 = vpop.permute.xlu1 %235 }
 0x259   :  { %v238_v45 = vmul.f32 %v2737_v25, %v236_v44 }
 0x25b   :  { %240 = vrot.lane.b32.xlu1 %v238_v45, %s2888_s3 }
 0x2cd   :  { %v241_v46 = vpop.permute.xlu1 %240 }
 0x2ce   :  { %v243_v47 = vsel %vm140_vm2, %v241_v46, 0.0  ;;  %2312 = vmatmul.mubr.msk.f32.vlgmr.msra.gmra.mrb[4].mxu1 %vm140_vm2, %v241_v46 }
 0x2cf   :  { %2301 = vmatmul.mubr.msk.f32.vlgmr.msra.gmra.mrb[0].mxu0 %vm252_vm3, %v243_v47  ;;  %2554 = vmatpush3.bf16.msra.mxu1 %v3015_v34 }
 0x2d0   :  { %2555 = vmatprep.subr.bf16.mxu1 %v2884_v6  ;;  %2566 = vmatpush3.bf16.msra.mxu0 %v2968_v9 }
 0x2d1   :  { %2567 = vmatprep.subr.bf16.mxu0 %v2884_v6  ;;  %2330 = vmatprep.mubr.msk.f32.mxu1 %vm2885_vm1, %v2886_v7 }
 0x2d2   :  { %2341 = vmatprep.mubr.msk.f32.mxu0 %vm2885_vm1, %v2886_v7 }
 0x2d3   :  { %2557 = vmatpush3.bf16.msra.mxu1 %v3021_v36 }
 0x2d4   :  { %2558 = vmatprep.subr.bf16.mxu1 %v2884_v6  ;;  %2569 = vmatpush3.bf16.msra.mxu0 %v2979_v12 }
 0x2d5   :  { %2570 = vmatprep.subr.bf16.mxu0 %v2884_v6 }
 0x2d7   :  { %2560 = vmatpush3.bf16.msra.mxu1 %v3031_v39 }
 0x2d8   :  { %2561 = vmatprep.subr.bf16.mxu1 %v2884_v6 }
 0x2db   :  { %2563 = vmatpush3.bf16.msra.mxu1 %v3042_v43 }
 0x2dc   :  { %2582 = vmatprep.subr.bf16.mxu1 %v2884_v6 }
 0x3a1   :  { %v418_v49 = vpop.f32.mrb[4].mxu1 }
 0x3a2   :  { %v423_v50 = vrot.slane %v418_v49, 6  ;;  %v322_v51 = vpop.f32.mrb[0].mxu0  ;;  %v2313_v52 = vpop.f32.mrb[5].mxu1 }
 0x3a3   :  { %v323_v53 = vadd.f32 %v3070_v48, %v322_v51  ;;  %v2302_v54 = vpop.f32.mrb[1].mxu0 }
 0x3a4   :  { %v425_v55 = vadd.f32 %v423_v50, %v2998_v17 }
 0x3a5   :  { %2740 = vtanh.f32 %v323_v53  ;;  %v2078_v58 = vmul.f32 -1.442695, %v323_v53 }
 0x3a6   :  { %2742 = vtanh.f32 %v425_v55  ;;  %v2080_v59 = vmul.f32 -1.442695, %v425_v55 }
 0x3a7   :  { %2744 = vpow2.f32 %v2078_v58 }
 0x3a8   :  { %2746 = vpow2.f32 %v2080_v59 }
 0x3af   :  { %v2741_v56 = vpop.eup %2740 }
 0x3b0   :  { %v2743_v57 = vpop.eup %2742  ;;  %335 = vrot.lane.b32.xlu0 %v2741_v56, %s2887_s28 }
 0x3b1   :  { %438 = vrot.lane.b32.xlu1 %v2743_v57, %s2887_s28  ;;  %v2745_v60 = vpop.eup %2744 }
 0x3b2   :  { %v2747_v61 = vpop.eup %2746  ;;  %v329_v62 = vadd.f32 1.0, %v2745_v60 }
 0x3b3   :  { %v429_v63 = vadd.f32 1.0, %v2747_v61 }
 0x3b4   :  { %2748 = vrcp.f32 %v329_v62 }
 0x3b5   :  { %2750 = vrcp.f32 %v429_v63 }
 0x3be   :  { %v2749_v0 = vpop.eup %2748 }
 0x3bf   :  { %v2751_v2 = vpop.eup %2750  ;;  %v333_v10 = vmul.f32 0.0, %v2749_v0 }
 0x3c0   :  { %v436_v13 = vmul.f32 %v2751_v2, %v434_v8 }
 0x422   :  { %v336_v1 = vpop.permute.xlu0 %335 }
 0x423   :  { %v338_v3 = vmul.f32 %v2749_v0, %v336_v1  ;;  %v439_v4 = vpop.permute.xlu1 %438 }
 0x424   :  { %v441_v5 = vmul.f32 %v2751_v2, %v439_v4 }
 0x425   :  { %340 = vrot.lane.b32.xlu0 %v338_v3, %s2888_s3 }
 0x426   :  { %443 = vrot.lane.b32.xlu1 %v441_v5, %s2888_s3 }
 0x497   :  { %v341_v11 = vpop.permute.xlu0 %340 }
 0x498   :  { %v3079_v14 = vadd.f32 %v341_v11, %v333_v10  ;;  %v444_v16 = vpop.permute.xlu1 %443 }
 0x499   :  { %v3081_v18 = vadd.f32 %v444_v16, %v436_v13 }
 0x49a   :  { %2752 = vtanh.f32 %v3079_v14 }
 0x49b   :  { %2754 = vtanh.f32 %v3081_v18  ;;  %v648_v59 = vrot.slane %v3081_v18, 6 }
 0x4a4   :  { %v2753_v19 = vpop.eup %2752 }
 0x4a5   :  { %v2755_v20 = vpop.eup %2754  ;;  %346 = vrot.lane.b32.xlu0 %v2753_v19, %s2887_s28 }
 0x4a6   :  { %449 = vrot.lane.b32.xlu1 %v2755_v20, %s2887_s28 }
 0x517   :  { %v347_v21 = vpop.permute.xlu0 %346 }
 0x518   :  { %v3087_v22 = vmul.f32 %v2749_v0, %v347_v21  ;;  %v450_v23 = vpop.permute.xlu1 %449 }
 0x519   :  { %v452_v24 = vmul.f32 %v2751_v2, %v450_v23 }
 0x51a   :  { %v458_v25 = vrot.slane %v3087_v22, 6 }
 0x51b   :  { %454 = vrot.lane.b32.xlu0 %v452_v24, %s2888_s3  ;;  %v561_v26 = vrot.slane %v452_v24, 2 }
 0x51c   :  { %459 = vrot.lane.b32.xlu1 %v458_v25, %s2887_s28 }
 0x51f   :  { %562 = vrot.lane.b32.xlu0 %v561_v26, %s2888_s3 }
 0x58d   :  { %v455_v27 = vpop.permute.xlu0 %454 }
 0x58e   :  { %v460_v28 = vpop.permute.xlu1 %459 }
 0x58f   :  { %v462_v29 = vsel %vm140_vm2, %v455_v27, %v460_v28 }
 0x590   :  { %v464_v30 = vrot.slane %v462_v29, 2 }
 0x591   :  { %v563_v31 = vpop.permute.xlu0 %562 }
 0x592   :  { %2331 = vmatmul.mubr.msk.f32.vlgmr.msra.gmra.mrb[6].mxu1 %vm252_vm3, %v464_v30  ;;  %2342 = vmatmul.mubr.msk.f32.vlgmr.msra.gmra.mrb[2].mxu0 %vm140_vm2, %v563_v31 }
 0x593   :  { %2572 = vmatpush3.bf16.msra.mxu0 %v3015_v34  ;;  %2584 = vmatpush3.bf16.msra.mxu1 %v2968_v9 }
 0x594   :  { %2573 = vmatprep.subr.bf16.mxu0 %v2884_v6  ;;  %2585 = vmatprep.subr.bf16.mxu1 %v2884_v6 }
 0x595   :  { %2360 = vmatprep.mubr.msk.f32.mxu0 %vm2885_vm1, %v2886_v7  ;;  %2371 = vmatprep.mubr.msk.f32.mxu1 %vm2885_vm1, %v2886_v7 }
 0x597   :  { %2575 = vmatpush3.bf16.msra.mxu0 %v3021_v36  ;;  %2587 = vmatpush3.bf16.msra.mxu1 %v2979_v12 }
 0x598   :  { %2576 = vmatprep.subr.bf16.mxu0 %v2884_v6  ;;  %2588 = vmatprep.subr.bf16.mxu1 %v2884_v6 }
 0x59b   :  { %2578 = vmatpush3.bf16.msra.mxu0 %v3031_v39 }
 0x59c   :  { %2579 = vmatprep.subr.bf16.mxu0 %v2884_v6 }
 0x59f   :  { %2581 = vmatpush3.bf16.msra.mxu0 %v3042_v43 }
 0x5a0   :  { %2600 = vmatprep.subr.bf16.mxu0 %v2884_v6 }
 0x665   :  { %v533_v32 = vpop.f32.mrb[6].mxu1  ;;  %v632_v33 = vpop.f32.mrb[2].mxu0 }
 0x666   :  { %v534_v35 = vadd.f32 %v3070_v48, %v533_v32  ;;  %v637_v37 = vrot.slane %v632_v33, 4  ;;  %v2332_v38 = vpop.f32.mrb[7].mxu1  ;;  %v2343_v40 = vpop.f32.mrb[3].mxu0 }
 0x668   :  { %2756 = vtanh.f32 %v534_v35  ;;  %v639_v41 = vadd.f32 %v637_v37, %v2998_v17  ;;  %v2082_v45 = vmul.f32 -1.442695, %v534_v35 }
 0x66a   :  { %2758 = vtanh.f32 %v639_v41  ;;  %v2084_v46 = vmul.f32 -1.442695, %v639_v41 }
 0x66b   :  { %2760 = vpow2.f32 %v2082_v45 }
 0x66c   :  { %2762 = vpow2.f32 %v2084_v46 }
 0x672   :  { %v2757_v42 = vpop.eup %2756 }
 0x673   :  { %546 = vrot.lane.b32.xlu1 %v2757_v42, %s2887_s28 }
 0x674   :  { %v2759_v44 = vpop.eup %2758 }
 0x675   :  { %652 = vrot.lane.b32.xlu0 %v2759_v44, %s2887_s28  ;;  %v2761_v47 = vpop.eup %2760 }
 0x676   :  { %v2763_v49 = vpop.eup %2762  ;;  %v540_v50 = vadd.f32 1.0, %v2761_v47 }
 0x677   :  { %v643_v51 = vadd.f32 1.0, %v2763_v49 }
 0x678   :  { %2764 = vrcp.f32 %v540_v50 }
 0x679   :  { %2766 = vrcp.f32 %v643_v51 }
 0x682   :  { %v2765_v52 = vpop.eup %2764 }
 0x683   :  { %v2767_v55 = vpop.eup %2766  ;;  %v544_v58 = vmul.f32 %v2765_v52, %v3079_v14 }
 0x684   :  { %v650_v62 = vmul.f32 %v2767_v55, %v648_v59 }
 0x6e5   :  { %v547_v53 = vpop.permute.xlu1 %546 }
 0x6e6   :  { %v549_v54 = vmul.f32 %v2765_v52, %v547_v53 }
 0x6e7   :  { %v653_v56 = vpop.permute.xlu0 %652 }
 0x6e8   :  { %551 = vrot.lane.b32.xlu1 %v549_v54, %s2888_s3  ;;  %v655_v57 = vmul.f32 %v2767_v55, %v653_v56 }
 0x6ea   :  { %657 = vrot.lane.b32.xlu0 %v655_v57, %s2888_s3 }
 0x75a   :  { %v552_v60 = vpop.permute.xlu1 %551 }
 0x75b   :  { %v3120_v61 = vadd.f32 %v552_v60, %v544_v58 }
 0x75c   :  { %v658_v63 = vpop.permute.xlu0 %657 }
 0x75d   :  { %2768 = vtanh.f32 %v3120_v61  ;;  %v3123_v0 = vadd.f32 %v658_v63, %v650_v62 }
 0x75f   :  { %2770 = vtanh.f32 %v3123_v0  ;;  %v862_v46 = vrot.slane %v3123_v0, 6 }
 0x767   :  { %v2769_v1 = vpop.eup %2768 }
 0x768   :  { %557 = vrot.lane.b32.xlu1 %v2769_v1, %s2887_s28 }
 0x769   :  { %v2771_v2 = vpop.eup %2770 }
 0x76a   :  { %663 = vrot.lane.b32.xlu0 %v2771_v2, %s2887_s28 }
 0x7da   :  { %v558_v3 = vpop.permute.xlu1 %557 }
 0x7db   :  { %v3128_v4 = vmul.f32 %v2765_v52, %v558_v3 }
 0x7dc   :  { %v664_v8 = vpop.permute.xlu0 %663 }
 0x7dd   :  { %v672_v5 = vrot.slane %v3128_v4, 4  ;;  %v666_v10 = vmul.f32 %v2767_v55, %v664_v8 }
 0x7df   :  { %673 = vrot.lane.b32.xlu0 %v672_v5, %s2887_s28  ;;  %668 = vrot.lane.b32.xlu1 %v666_v10, %s2888_s3  ;;  %v775_v11 = vrot.slane %v666_v10, 4 }
 0x7e3   :  { %776 = vrot.lane.b32.xlu1 %v775_v11, %s2888_s3 }
 0x851   :  { %v674_v13 = vpop.permute.xlu0 %673  ;;  %v669_v14 = vpop.permute.xlu1 %668 }
 0x852   :  { %v676_v16 = vsel %vm140_vm2, %v669_v14, %v674_v13 }
 0x853   :  { %v678_v18 = vrot.slane %v676_v16, 4 }
 0x855   :  { %v777_v19 = vpop.permute.xlu1 %776  ;;  %2361 = vmatmul.mubr.msk.f32.vlgmr.msra.gmra.mrb[4].mxu0 %vm252_vm3, %v678_v18 }
 0x856   :  { %2372 = vmatmul.mubr.msk.f32.vlgmr.msra.gmra.mrb[8].mxu1 %vm140_vm2, %v777_v19  ;;  %2602 = vmatpush3.bf16.msra.mxu0 %v2968_v9 }
 0x857   :  { %2590 = vmatpush3.bf16.msra.mxu1 %v3015_v34  ;;  %2603 = vmatprep.subr.bf16.mxu0 %v2884_v6 }
 0x858   :  { %2591 = vmatprep.subr.bf16.mxu1 %v2884_v6  ;;  %2390 = vmatprep.mubr.msk.f32.mxu1 %vm2885_vm1, %v2886_v7 }
 0x859   :  { %2401 = vmatprep.mubr.msk.f32.mxu0 %vm2885_vm1, %v2886_v7 }
 0x85a   :  { %2605 = vmatpush3.bf16.msra.mxu0 %v2979_v12 }
 0x85b   :  { %2593 = vmatpush3.bf16.msra.mxu1 %v3021_v36  ;;  %2606 = vmatprep.subr.bf16.mxu0 %v2884_v6 }
 0x85c   :  { %2594 = vmatprep.subr.bf16.mxu1 %v2884_v6 }
 0x85f   :  { %2596 = vmatpush3.bf16.msra.mxu1 %v3031_v39 }
 0x860   :  { %2597 = vmatprep.subr.bf16.mxu1 %v2884_v6 }
 0x863   :  { %2599 = vmatpush3.bf16.msra.mxu1 %v3042_v43 }
 0x864   :  { %2618 = vmatprep.subr.bf16.mxu1 %v2884_v6 }
 0x928   :  { %v747_v20 = vpop.f32.mrb[4].mxu0 }
 0x929   :  { %v748_v21 = vadd.f32 %v3070_v48, %v747_v20  ;;  %v2362_v23 = vpop.f32.mrb[5].mxu0  ;;  %v846_v24 = vpop.f32.mrb[8].mxu1 }
 0x92a   :  { %v851_v25 = vrot.slane %v846_v24, 2  ;;  %v2373_v26 = vpop.f32.mrb[9].mxu1 }
 0x92b   :  { %2772 = vtanh.f32 %v748_v21  ;;  %v2086_v30 = vmul.f32 -1.442695, %v748_v21 }
 0x92c   :  { %v853_v27 = vadd.f32 %v851_v25, %v2998_v17 }
 0x92e   :  { %2774 = vtanh.f32 %v853_v27  ;;  %v2088_v31 = vmul.f32 -1.442695, %v853_v27 }
 0x92f   :  { %2776 = vpow2.f32 %v2086_v30 }
 0x930   :  { %2778 = vpow2.f32 %v2088_v31 }
 0x935   :  { %v2773_v28 = vpop.eup %2772 }
 0x936   :  { %760 = vrot.lane.b32.xlu0 %v2773_v28, %s2887_s28 }
 0x938   :  { %v2775_v29 = vpop.eup %2774 }
 0x939   :  { %866 = vrot.lane.b32.xlu1 %v2775_v29, %s2887_s28  ;;  %v2777_v32 = vpop.eup %2776 }
 0x93a   :  { %v2779_v33 = vpop.eup %2778  ;;  %v754_v35 = vadd.f32 1.0, %v2777_v32 }
 0x93b   :  { %v857_v37 = vadd.f32 1.0, %v2779_v33 }
 0x93c   :  { %2780 = vrcp.f32 %v754_v35 }
 0x93d   :  { %2782 = vrcp.f32 %v857_v37 }
 0x946   :  { %v2781_v38 = vpop.eup %2780 }
 0x947   :  { %v2783_v41 = vpop.eup %2782  ;;  %v758_v45 = vmul.f32 %v2781_v38, %v3120_v61 }
 0x948   :  { %v864_v50 = vmul.f32 %v2783_v41, %v862_v46 }
 0x9a8   :  { %v761_v40 = vpop.permute.xlu0 %760 }
 0x9a9   :  { %v763_v17 = vmul.f32 %v2781_v38, %v761_v40 }
 0x9ab   :  { %v867_v42 = vpop.permute.xlu1 %866  ;;  %765 = vrot.lane.b32.xlu0 %v763_v17, %s2888_s3 }
 0x9ac   :  { %v869_v44 = vmul.f32 %v2783_v41, %v867_v42 }
 0x9ae   :  { %871 = vrot.lane.b32.xlu1 %v869_v44, %s2888_s3 }
 0xa1d   :  { %v766_v47 = vpop.permute.xlu0 %765 }
 0xa1e   :  { %v3161_v49 = vadd.f32 %v766_v47, %v758_v45 }
 0xa20   :  { %2784 = vtanh.f32 %v3161_v49  ;;  %v872_v51 = vpop.permute.xlu1 %871 }
 0xa21   :  { %v3164_v52 = vadd.f32 %v872_v51, %v864_v50 }
 0xa23   :  { %2786 = vtanh.f32 %v3164_v52  ;;  %v1073_v30 = vrot.slane %v3164_v52, 6 }
 0xa2a   :  { %v2785_v53 = vpop.eup %2784 }
 0xa2b   :  { %771 = vrot.lane.b32.xlu0 %v2785_v53, %s2887_s28 }
 0xa2d   :  { %v2787_v54 = vpop.eup %2786 }
 0xa2e   :  { %877 = vrot.lane.b32.xlu1 %v2787_v54, %s2887_s28 }
 0xa9d   :  { %v772_v55 = vpop.permute.xlu0 %771 }
 0xa9e   :  { %v3169_v56 = vmul.f32 %v2781_v38, %v772_v55 }
 0xaa0   :  { %v886_v57 = vrot.slane %v3169_v56, 2  ;;  %v878_v58 = vpop.permute.xlu1 %877 }
 0xaa1   :  { %v880_v59 = vmul.f32 %v2783_v41, %v878_v58 }
 0xaa2   :  { %887 = vrot.lane.b32.xlu1 %v886_v57, %s2887_s28 }
 0xaa3   :  { %882 = vrot.lane.b32.xlu0 %v880_v59, %s2888_s3  ;;  %v989_v60 = vrot.slane %v880_v59, 6 }
 0xaa7   :  { %990 = vrot.lane.b32.xlu0 %v989_v60, %s2888_s3 }
 0xb14   :  { %v888_v61 = vpop.permute.xlu1 %887 }
 0xb15   :  { %v883_v62 = vpop.permute.xlu0 %882 }
 0xb16   :  { %v890_v63 = vsel %vm140_vm2, %v883_v62, %v888_v61 }
 0xb17   :  { %v892_v0 = vrot.slane %v890_v63, 6 }
 0xb19   :  { %2391 = vmatmul.mubr.msk.f32.vlgmr.msra.gmra.mrb[10].mxu1 %vm252_vm3, %v892_v0  ;;  %v991_v1 = vpop.permute.xlu0 %990 }
 0xb1a   :  { %2402 = vmatmul.mubr.msk.f32.vlgmr.msra.gmra.mrb[6].mxu0 %vm140_vm2, %v991_v1  ;;  %2620 = vmatpush3.bf16.msra.mxu1 %v2968_v9 }
 0xb1b   :  { %2608 = vmatpush3.bf16.msra.mxu0 %v3015_v34  ;;  %2621 = vmatprep.subr.bf16.mxu1 %v2884_v6 }
 0xb1c   :  { %2609 = vmatprep.subr.bf16.mxu0 %v2884_v6  ;;  %2431 = vmatprep.mubr.msk.f32.mxu1 %vm2885_vm1, %v2886_v7 }
 0xb1d   :  { %2420 = vmatprep.mubr.msk.f32.mxu0 %vm2885_vm1, %v2886_v7 }
 0xb1e   :  { %2623 = vmatpush3.bf16.msra.mxu1 %v2979_v12 }
 0xb1f   :  { %2611 = vmatpush3.bf16.msra.mxu0 %v3021_v36  ;;  %2624 = vmatprep.subr.bf16.mxu1 %v2884_v6 }
 0xb20   :  { %2612 = vmatprep.subr.bf16.mxu0 %v2884_v6 }
 0xb23   :  { %2614 = vmatpush3.bf16.msra.mxu0 %v3031_v39 }
 0xb24   :  { %2615 = vmatprep.subr.bf16.mxu0 %v2884_v6 }
 0xb27   :  { %2617 = vmatpush3.bf16.msra.mxu0 %v3042_v43 }
 0xb28   :  { %2636 = vmatprep.subr.bf16.mxu0 %v2884_v6 }
 0xbec   :  { %v961_v2 = vpop.f32.mrb[10].mxu1 }
 0xbed   :  { %v962_v3 = vadd.f32 %v3070_v48, %v961_v2  ;;  %v2392_v5 = vpop.f32.mrb[11].mxu1  ;;  %v1060_v8 = vpop.f32.mrb[6].mxu0 }
 0xbee   :  { %v1064_v10 = vadd.f32 %v1060_v8, %v2996_v15  ;;  %v2403_v11 = vpop.f32.mrb[7].mxu0 }
 0xbef   :  { %2788 = vtanh.f32 %v962_v3  ;;  %v2090_v16 = vmul.f32 -1.442695, %v962_v3 }
 0xbf0   :  { %2790 = vtanh.f32 %v1064_v10  ;;  %v2092_v18 = vmul.f32 -1.442695, %v1064_v10 }
 0xbf1   :  { %2792 = vpow2.f32 %v2090_v16 }
 0xbf2   :  { %2794 = vpow2.f32 %v2092_v18 }
 0xbf9   :  { %v2789_v13 = vpop.eup %2788 }
 0xbfa   :  { %v2791_v14 = vpop.eup %2790  ;;  %974 = vrot.lane.b32.xlu1 %v2789_v13, %s2887_s28 }
 0xbfb   :  { %1077 = vrot.lane.b32.xlu0 %v2791_v14, %s2887_s28  ;;  %v2793_v19 = vpop.eup %2792 }
 0xbfc   :  { %v2795_v20 = vpop.eup %2794  ;;  %v968_v21 = vadd.f32 1.0, %v2793_v19 }
 0xbfd   :  { %v1068_v23 = vadd.f32 1.0, %v2795_v20 }
 0xbfe   :  { %2796 = vrcp.f32 %v968_v21 }
 0xbff   :  { %2798 = vrcp.f32 %v1068_v23 }
 0xc08   :  { %v2797_v24 = vpop.eup %2796 }
 0xc09   :  { %v2799_v26 = vpop.eup %2798  ;;  %v972_v31 = vmul.f32 %v2797_v24, %v3161_v49 }
 0xc0a   :  { %v1075_v33 = vmul.f32 %v2799_v26, %v1073_v30 }
 0xc6c   :  { %v975_v25 = vpop.permute.xlu1 %974 }
 0xc6d   :  { %v977_v27 = vmul.f32 %v2797_v24, %v975_v25  ;;  %v1078_v28 = vpop.permute.xlu0 %1077 }
 0xc6e   :  { %v1080_v29 = vmul.f32 %v2799_v26, %v1078_v28 }
 0xc6f   :  { %979 = vrot.lane.b32.xlu1 %v977_v27, %s2888_s3 }
 0xc70   :  { %1082 = vrot.lane.b32.xlu0 %v1080_v29, %s2888_s3 }
 0xce1   :  { %v980_v32 = vpop.permute.xlu1 %979 }
 0xce2   :  { %v3202_v35 = vadd.f32 %v980_v32, %v972_v31  ;;  %v1083_v37 = vpop.permute.xlu0 %1082 }
 0xce3   :  { %v3204_v38 = vadd.f32 %v1083_v37, %v1075_v33 }
 0xce4   :  { %2800 = vtanh.f32 %v3202_v35 }
 0xce5   :  { %2802 = vtanh.f32 %v3204_v38  ;;  %v1282_v13 = vrot.slane %v3204_v38, 6 }
 0xcee   :  { %v2801_v40 = vpop.eup %2800 }
 0xcef   :  { %v2803_v17 = vpop.eup %2802  ;;  %985 = vrot.lane.b32.xlu1 %v2801_v40, %s2887_s28 }
 0xcf0   :  { %1088 = vrot.lane.b32.xlu0 %v2803_v17, %s2887_s28 }
 0xd61   :  { %v986_v41 = vpop.permute.xlu1 %985 }
 0xd62   :  { %v3210_v42 = vmul.f32 %v2797_v24, %v986_v41  ;;  %v1089_v44 = vpop.permute.xlu0 %1088 }
 0xd63   :  { %v1091_v45 = vmul.f32 %v2799_v26, %v1089_v44 }
 0xd64   :  { %1097 = vrot.lane.b32.xlu0 %v3210_v42, %s2887_s28 }
 0xd65   :  { %1093 = vrot.lane.b32.xlu1 %v1091_v45, %s2888_s3 }
 0xdd6   :  { %v1098_v46 = vpop.permute.xlu0 %1097 }
 0xdd7   :  { %v1094_v47 = vpop.permute.xlu1 %1093 }
 0xdd8   :  { %v1100_v49 = vsel %vm140_vm2, %v1094_v47, %v1098_v46  ;;  %2432 = vmatmul.mubr.msk.f32.vlgmr.msra.gmra.mrb[12].mxu1 %vm140_vm2, %v1094_v47 }
 0xdd9   :  { %2421 = vmatmul.mubr.msk.f32.vlgmr.msra.gmra.mrb[8].mxu0 %vm252_vm3, %v1100_v49  ;;  %2626 = vmatpush3.bf16.msra.mxu1 %v3015_v34 }
 0xdda   :  { %2627 = vmatprep.subr.bf16.mxu1 %v2884_v6  ;;  %2638 = vmatpush3.bf16.msra.mxu0 %v2968_v9 }
 0xddb   :  { %2639 = vmatprep.subr.bf16.mxu0 %v2884_v6  ;;  %2450 = vmatprep.mubr.msk.f32.mxu1 %vm2885_vm1, %v2886_v7 }
 0xddc   :  { %2461 = vmatprep.mubr.msk.f32.mxu0 %vm2885_vm1, %v2886_v7 }
 0xddd   :  { %2629 = vmatpush3.bf16.msra.mxu1 %v3021_v36 }
 0xdde   :  { %2630 = vmatprep.subr.bf16.mxu1 %v2884_v6  ;;  %2641 = vmatpush3.bf16.msra.mxu0 %v2979_v12 }
 0xddf   :  { %2642 = vmatprep.subr.bf16.mxu0 %v2884_v6 }
 0xde1   :  { %2632 = vmatpush3.bf16.msra.mxu1 %v3031_v39 }
 0xde2   :  { %2633 = vmatprep.subr.bf16.mxu1 %v2884_v6 }
 0xde5   :  { %2635 = vmatpush3.bf16.msra.mxu1 %v3042_v43 }
 0xde6   :  { %2654 = vmatprep.subr.bf16.mxu1 %v2884_v6 }
 0xeab   :  { %v1266_v50 = vpop.f32.mrb[12].mxu1 }
 0xeac   :  { %v1271_v51 = vrot.slane %v1266_v50, 6  ;;  %v1170_v52 = vpop.f32.mrb[8].mxu0  ;;  %v2433_v53 = vpop.f32.mrb[13].mxu1 }
 0xead   :  { %v1171_v54 = vadd.f32 %v3070_v48, %v1170_v52  ;;  %v2422_v55 = vpop.f32.mrb[9].mxu0 }
 0xeae   :  { %v1273_v57 = vadd.f32 %v1271_v51, %v2996_v15 }
 0xeaf   :  { %2804 = vtanh.f32 %v1171_v54  ;;  %v2094_v60 = vmul.f32 -1.442695, %v1171_v54 }
 0xeb0   :  { %2806 = vtanh.f32 %v1273_v57  ;;  %v2096_v61 = vmul.f32 -1.442695, %v1273_v57 }
 0xeb1   :  { %2808 = vpow2.f32 %v2094_v60 }
 0xeb2   :  { %2810 = vpow2.f32 %v2096_v61 }
 0xeb9   :  { %v2805_v58 = vpop.eup %2804 }
 0xeba   :  { %v2807_v59 = vpop.eup %2806  ;;  %1183 = vrot.lane.b32.xlu1 %v2805_v58, %s2887_s28 }
 0xebb   :  { %1286 = vrot.lane.b32.xlu0 %v2807_v59, %s2887_s28  ;;  %v2809_v62 = vpop.eup %2808 }
 0xebc   :  { %v2811_v63 = vpop.eup %2810  ;;  %v1177_v0 = vadd.f32 1.0, %v2809_v62 }
 0xebd   :  { %v1277_v1 = vadd.f32 1.0, %v2811_v63 }
 0xebe   :  { %2812 = vrcp.f32 %v1177_v0 }
 0xebf   :  { %2814 = vrcp.f32 %v1277_v1 }
 0xec8   :  { %v2813_v2 = vpop.eup %2812 }
 0xec9   :  { %v2815_v5 = vpop.eup %2814  ;;  %v1181_v14 = vmul.f32 %v2813_v2, %v3202_v35 }
 0xeca   :  { %v1284_v18 = vmul.f32 %v2815_v5, %v1282_v13 }
 0xf2c   :  { %v1184_v3 = vpop.permute.xlu1 %1183 }
 0xf2d   :  { %v1186_v8 = vmul.f32 %v2813_v2, %v1184_v3  ;;  %v1287_v10 = vpop.permute.xlu0 %1286 }
 0xf2e   :  { %v1289_v11 = vmul.f32 %v2815_v5, %v1287_v10 }
 0xf2f   :  { %1188 = vrot.lane.b32.xlu1 %v1186_v8, %s2888_s3 }
 0xf30   :  { %1291 = vrot.lane.b32.xlu0 %v1289_v11, %s2888_s3 }
 0xfa1   :  { %v1189_v16 = vpop.permute.xlu1 %1188 }
 0xfa2   :  { %v3242_v19 = vadd.f32 %v1189_v16, %v1181_v14  ;;  %v1292_v20 = vpop.permute.xlu0 %1291 }
 0xfa3   :  { %v3244_v21 = vadd.f32 %v1292_v20, %v1284_v18 }
 0xfa4   :  { %2816 = vtanh.f32 %v3242_v19 }
 0xfa5   :  { %2818 = vtanh.f32 %v3244_v21  ;;  %v1496_v62 = vrot.slane %v3244_v21, 6 }
 0xfae   :  { %v2817_v23 = vpop.eup %2816 }
 0xfaf   :  { %v2819_v24 = vpop.eup %2818  ;;  %1194 = vrot.lane.b32.xlu1 %v2817_v23, %s2887_s28 }
 0xfb0   :  { %1297 = vrot.lane.b32.xlu0 %v2819_v24, %s2887_s28 }
0x1021   :  { %v1195_v25 = vpop.permute.xlu1 %1194 }
0x1022   :  { %v3250_v26 = vmul.f32 %v2813_v2, %v1195_v25  ;;  %v1298_v27 = vpop.permute.xlu0 %1297 }
0x1023   :  { %v1300_v28 = vmul.f32 %v2815_v5, %v1298_v27 }
0x1024   :  { %v1306_v29 = vrot.slane %v3250_v26, 6 }
0x1025   :  { %1302 = vrot.lane.b32.xlu1 %v1300_v28, %s2888_s3  ;;  %v1409_v30 = vrot.slane %v1300_v28, 2 }
0x1026   :  { %1307 = vrot.lane.b32.xlu0 %v1306_v29, %s2887_s28 }
0x1029   :  { %1410 = vrot.lane.b32.xlu1 %v1409_v30, %s2888_s3 }
0x1097   :  { %v1303_v31 = vpop.permute.xlu1 %1302 }
0x1098   :  { %v1308_v32 = vpop.permute.xlu0 %1307 }
0x1099   :  { %v1310_v33 = vsel %vm140_vm2, %v1303_v31, %v1308_v32 }
0x109a   :  { %v1312_v35 = vrot.slane %v1310_v33, 2 }
0x109b   :  { %v1411_v37 = vpop.permute.xlu1 %1410 }
0x109c   :  { %2451 = vmatmul.mubr.msk.f32.vlgmr.msra.gmra.mrb[14].mxu1 %vm252_vm3, %v1312_v35  ;;  %2462 = vmatmul.mubr.msk.f32.vlgmr.msra.gmra.mrb[10].mxu0 %vm140_vm2, %v1411_v37 }
0x109d   :  { %2644 = vmatpush3.bf16.msra.mxu0 %v3015_v34  ;;  %2656 = vmatpush3.bf16.msra.mxu1 %v2968_v9 }
0x109e   :  { %2645 = vmatprep.subr.bf16.mxu0 %v2884_v6  ;;  %2657 = vmatprep.subr.bf16.mxu1 %v2884_v6 }
0x109f   :  { %2480 = vmatprep.mubr.msk.f32.mxu0 %vm2885_vm1, %v2886_v7  ;;  %2491 = vmatprep.mubr.msk.f32.mxu1 %vm2885_vm1, %v2886_v7 }
0x10a1   :  { %2647 = vmatpush3.bf16.msra.mxu0 %v3021_v36  ;;  %2659 = vmatpush3.bf16.msra.mxu1 %v2979_v12 }
0x10a2   :  { %2648 = vmatprep.subr.bf16.mxu0 %v2884_v6  ;;  %2660 = vmatprep.subr.bf16.mxu1 %v2884_v6 }
0x10a5   :  { %2650 = vmatpush3.bf16.msra.mxu0 %v3031_v39 }
0x10a6   :  { %2651 = vmatprep.subr.bf16.mxu0 %v2884_v6 }
0x10a9   :  { %2653 = vmatpush3.bf16.msra.mxu0 %v3042_v43 }
0x116f   :  { %v1381_v9 = vpop.f32.mrb[14].mxu1  ;;  %v1480_v38 = vpop.f32.mrb[10].mxu0 }
0x1170   :  { %v1382_v40 = vadd.f32 %v3070_v48, %v1381_v9  ;;  %v1485_v17 = vrot.slane %v1480_v38, 4  ;;  %v2452_v41 = vpop.f32.mrb[15].mxu1  ;;  %v2463_v44 = vpop.f32.mrb[11].mxu0 }
0x1172   :  { %2820 = vtanh.f32 %v1382_v40  ;;  %v1487_v12 = vadd.f32 %v1485_v17, %v2996_v15  ;;  %v2098_v47 = vmul.f32 -1.442695, %v1382_v40 }
0x1174   :  { %2822 = vtanh.f32 %v1487_v12  ;;  %v2100_v49 = vmul.f32 -1.442695, %v1487_v12 }
0x1175   :  { %2824 = vpow2.f32 %v2098_v47 }
0x1176   :  { %2826 = vpow2.f32 %v2100_v49 }
0x117c   :  { %v2821_v45 = vpop.eup %2820 }
0x117d   :  { %1394 = vrot.lane.b32.xlu0 %v2821_v45, %s2887_s28 }
0x117e   :  { %v2823_v46 = vpop.eup %2822 }
0x117f   :  { %1500 = vrot.lane.b32.xlu1 %v2823_v46, %s2887_s28  ;;  %v2825_v50 = vpop.eup %2824 }
0x1180   :  { %v2827_v51 = vpop.eup %2826  ;;  %v1388_v52 = vadd.f32 1.0, %v2825_v50 }
0x1181   :  { %v1491_v53 = vadd.f32 1.0, %v2827_v51 }
0x1182   :  { %2828 = vrcp.f32 %v1388_v52 }
0x1183   :  { %2830 = vrcp.f32 %v1491_v53 }
0x118c   :  { %v2829_v54 = vpop.eup %2828 }
0x118d   :  { %v2831_v58 = vpop.eup %2830  ;;  %v1392_v61 = vmul.f32 %v2829_v54, %v3242_v19 }
0x118e   :  { %v1498_v1 = vmul.f32 %v2831_v58, %v1496_v62 }
0x11ef   :  { %v1395_v55 = vpop.permute.xlu0 %1394 }
0x11f0   :  { %v1397_v57 = vmul.f32 %v2829_v54, %v1395_v55 }
0x11f1   :  { %v1501_v59 = vpop.permute.xlu1 %1500 }
0x11f2   :  { %1399 = vrot.lane.b32.xlu0 %v1397_v57, %s2888_s3  ;;  %v1503_v60 = vmul.f32 %v2831_v58, %v1501_v59 }
0x11f4   :  { %1505 = vrot.lane.b32.xlu1 %v1503_v60, %s2888_s3 }
0x1264   :  { %v1400_v63 = vpop.permute.xlu0 %1399 }
0x1265   :  { %v3282_v0 = vadd.f32 %v1400_v63, %v1392_v61 }
0x1266   :  { %v1506_v2 = vpop.permute.xlu1 %1505 }
0x1267   :  { %2832 = vtanh.f32 %v3282_v0  ;;  %v3285_v3 = vadd.f32 %v1506_v2, %v1498_v1 }
0x1269   :  { %2834 = vtanh.f32 %v3285_v3  ;;  %v1710_v45 = vrot.slane %v3285_v3, 6 }
0x1271   :  { %v2833_v5 = vpop.eup %2832 }
0x1272   :  { %1405 = vrot.lane.b32.xlu0 %v2833_v5, %s2887_s28 }
0x1273   :  { %v2835_v8 = vpop.eup %2834 }
0x1274   :  { %1511 = vrot.lane.b32.xlu1 %v2835_v8, %s2887_s28 }
0x12e4   :  { %v1406_v10 = vpop.permute.xlu0 %1405 }
0x12e5   :  { %v3290_v11 = vmul.f32 %v2829_v54, %v1406_v10 }
0x12e6   :  { %v1512_v14 = vpop.permute.xlu1 %1511 }
0x12e7   :  { %v1520_v13 = vrot.slane %v3290_v11, 4  ;;  %v1514_v16 = vmul.f32 %v2831_v58, %v1512_v14 }
0x12e9   :  { %1521 = vrot.lane.b32.xlu1 %v1520_v13, %s2887_s28  ;;  %1516 = vrot.lane.b32.xlu0 %v1514_v16, %s2888_s3  ;;  %v1623_v18 = vrot.slane %v1514_v16, 4 }
0x12ed   :  { %1624 = vrot.lane.b32.xlu0 %v1623_v18, %s2888_s3  ;;  %v1879_v18 = vld [vmem:[%s3484_s6 + $0x88] sm:$0xff] }
0x135b   :  { %v1522_v19 = vpop.permute.xlu1 %1521  ;;  %v1517_v20 = vpop.permute.xlu0 %1516 }
0x135c   :  { %v1524_v21 = vsel %vm140_vm2, %v1517_v20, %v1522_v19  ;;  %v1862_v19 = vld [vmem:[%s3484_s6] sm:$0xff] }
0x135d   :  { %v1526_v23 = vrot.slane %v1524_v21, 4  ;;  %v1863_v21 = vld [vmem:[%s3484_s6 + $0x8] sm:$0xff] }
0x135f   :  { %v1625_v24 = vpop.permute.xlu0 %1624  ;;  %2481 = vmatmul.mubr.msk.f32.vlgmr.msra.gmra.mrb[12].mxu0 %vm252_vm3, %v1526_v23 }
0x1360   :  { %2492 = vmatmul.mubr.msk.f32.vlgmr.msra.gmra.mrb[16].mxu1 %vm140_vm2, %v1625_v24  ;;  %v2674_v24 = vpack.c.bf16 %v1863_v21, %v1862_v19 }
0x1361   :  { %2662 = vmatpush3.bf16.msra.mxu1 %v3015_v34  ;;  %2510 = vmatprep.mubr.msk.f32.mxu1 %vm2885_vm1, %v2886_v7 }
0x1362   :  { %2663 = vmatprep.subr.bf16.mxu1 %v2884_v6 }
0x1365   :  { %2665 = vmatpush3.bf16.msra.mxu1 %v3021_v36 }
0x1366   :  { %2666 = vmatprep.subr.bf16.mxu1 %v2884_v6 }
0x1369   :  { %2668 = vmatpush3.bf16.msra.mxu1 %v3031_v39 }
0x136a   :  { %2669 = vmatprep.subr.bf16.mxu1 %v2884_v6 }
0x136d   :  { %2671 = vmatpush3.bf16.msra.mxu1 %v3042_v43 }
0x136e   :  { %2704 = vmatprep.subr.bf16.mxu1 %v2884_v6 }
0x1432   :  { %v1595_v25 = vpop.f32.mrb[12].mxu0 }
0x1433   :  { %v1596_v34 = vadd.f32 %v3070_v48, %v1595_v25  ;;  %v2482_v27 = vpop.f32.mrb[13].mxu0  ;;  %v1694_v28 = vpop.f32.mrb[16].mxu1 }
0x1434   :  { %v1699_v29 = vrot.slane %v1694_v28, 2  ;;  %v2493_v30 = vpop.f32.mrb[17].mxu1  ;;  %v1865_v27 = vld [vmem:[%s3484_s6 + $0x18] sm:$0xff]  ;;  %v1882_v28 = vld [vmem:[%s3484_s6 + $0xa0] sm:$0xff] }
0x1435   :  { %2836 = vtanh.f32 %v1596_v34  ;;  %v2102_v43 = vmul.f32 -1.442695, %v1596_v34  ;;  %v1864_v34 = vld [vmem:[%s3484_s6 + $0x10] sm:$0xff] }
0x1436   :  { %v1701_v36 = vadd.f32 %v1699_v29, %v2996_v15  ;;  %v1883_v29 = vld [vmem:[%s3484_s6 + $0xa8] sm:$0xff] }
0x1437   :  { %v2680_v30 = vpack.c.bf16 %v1883_v29, %v1882_v28  ;;  %v1974_v28 = vld [vmem:[%s3486_s8 + $0x10] sm:$0xff] }
0x1438   :  { %2838 = vtanh.f32 %v1701_v36  ;;  %v2104_v32 = vmul.f32 -1.442695, %v1701_v36  ;;  %v1866_v36 = vld [vmem:[%s3484_s6 + $0x20] sm:$0xff] }
0x1439   :  { %2840 = vpow2.f32 %v2102_v43  ;;  %v1885_v43 = vld [vmem:[%s3484_s6 + $0xb8] sm:$0xff] }
0x143a   :  { %2842 = vpow2.f32 %v2104_v32 }
0x143f   :  { %v2837_v31 = vpop.eup %2836 }
0x1440   :  { %1608 = vrot.lane.b32.xlu1 %v2837_v31, %s2887_s28  ;;  %v1867_v31 = vld [vmem:[%s3484_s6 + $0x28] sm:$0xff] }
0x1441   :  { %v2682_v32 = vpack.c.bf16 %v1867_v31, %v1866_v36 }
0x1442   :  { %v2839_v39 = vpop.eup %2838 }
0x1443   :  { %1714 = vrot.lane.b32.xlu0 %v2839_v39, %s2887_s28  ;;  %v2841_v33 = vpop.eup %2840  ;;  %v1884_v39 = vld [vmem:[%s3484_s6 + $0xb0] sm:$0xff] }
0x1444   :  { %v2843_v35 = vpop.eup %2842  ;;  %v1602_v37 = vadd.f32 1.0, %v2841_v33  ;;  %v2684_v33 = vpack.c.bf16 %v1885_v43, %v1884_v39 }
0x1445   :  { %v1705_v9 = vadd.f32 1.0, %v2843_v35  ;;  %v1868_v35 = vld [vmem:[%s3484_s6 + $0x30] sm:$0xff] }
0x1446   :  { %2844 = vrcp.f32 %v1602_v37  ;;  %v1869_v37 = vld [vmem:[%s3484_s6 + $0x38] sm:$0xff] }
0x1447   :  { %2846 = vrcp.f32 %v1705_v9  ;;  %v1886_v9 = vld [vmem:[%s3484_s6 + $0xc0] sm:$0xff] }
0x1450   :  { %v2845_v38 = vpop.eup %2844 }
0x1451   :  { %v2847_v17 = vpop.eup %2846  ;;  %v1606_v12 = vmul.f32 %v2845_v38, %v3282_v0 }
0x1452   :  { %v1712_v49 = vmul.f32 %v2847_v17, %v1710_v45 }
0x14b2   :  { %v1609_v40 = vpop.permute.xlu1 %1608 }
0x14b3   :  { %v1611_v15 = vmul.f32 %v2845_v38, %v1609_v40  ;;  %v2686_v40 = vpack.c.bf16 %v1869_v37, %v1868_v35 }
0x14b5   :  { %v1715_v41 = vpop.permute.xlu0 %1714  ;;  %1613 = vrot.lane.b32.xlu1 %v1611_v15, %s2888_s3 }
0x14b6   :  { %v1717_v44 = vmul.f32 %v2847_v17, %v1715_v41  ;;  %v1871_v41 = vld [vmem:[%s3484_s6 + $0x48] sm:$0xff] }
0x14b8   :  { %1719 = vrot.lane.b32.xlu0 %v1717_v44, %s2888_s3  ;;  %v1888_v44 = vld [vmem:[%s3484_s6 + $0xd0] sm:$0xff] }
0x1527   :  { %v1614_v46 = vpop.permute.xlu1 %1613 }
0x1528   :  { %v3317_v47 = vadd.f32 %v1614_v46, %v1606_v12  ;;  %v1889_v12 = vld [vmem:[%s3484_s6 + $0xd8] sm:$0xff] }
0x1529   :  { %v2692_v46 = vpack.c.bf16 %v1889_v12, %v1888_v44 }
0x152a   :  { %2848 = vtanh.f32 %v3317_v47  ;;  %v1720_v50 = vpop.permute.xlu0 %1719 }
0x152b   :  { %v1722_v51 = vadd.f32 %v1720_v50, %v1712_v49  ;;  %v1872_v49 = vld [vmem:[%s3484_s6 + $0x50] sm:$0xff]  ;;  %v1873_v50 = vld [vmem:[%s3484_s6 + $0x58] sm:$0xff] }
0x152d   :  { %2850 = vtanh.f32 %v1722_v51  ;;  %v2694_v51 = vpack.c.bf16 %v1873_v50, %v1872_v49 }
0x1534   :  { %v2849_v52 = vpop.eup %2848 }
0x1535   :  { %1619 = vrot.lane.b32.xlu1 %v2849_v52, %s2887_s28 }
0x1537   :  { %v2851_v53 = vpop.eup %2850 }
0x1538   :  { %1725 = vrot.lane.b32.xlu0 %v2851_v53, %s2887_s28 }
0x15a7   :  { %v1620_v54 = vpop.permute.xlu1 %1619 }
0x15a8   :  { %v1622_v55 = vmul.f32 %v2845_v38, %v1620_v54  ;;  %v1887_v38 = vld [vmem:[%s3484_s6 + $0xc8] sm:$0xff]  ;;  %v1890_v54 = vld [vmem:[%s3484_s6 + $0xe0] sm:$0xff] }
0x15a9   :  { %v2688_v15 = vpack.c.bf16 %v1887_v38, %v1886_v9 }
0x15aa   :  { %v1734_v57 = vrot.slane %v1622_v55, 2  ;;  %v1726_v58 = vpop.permute.xlu0 %1725  ;;  %v2727_v23 = vpack.i.bf16 %v3169_v56, %v1622_v55  ;;  %v2678_v56 = vpack.c.bf16 %v1865_v27, %v1864_v34  ;;  %v1891_v55 = vld [vmem:[%s3484_s6 + $0xe8] sm:$0xff]  ;;  %v1972_v34 = vld [vmem:[%s3486_s8] sm:$0xff] }
0x15ab   :  { %v1728_v59 = vmul.f32 %v2847_v17, %v1726_v58  ;;  %v1870_v17 = vld [vmem:[%s3484_s6 + $0x40] sm:$0xff]  ;;  %v2696_v58 = vpack.c.bf16 %v1891_v55, %v1890_v54 }
0x15ac   :  { %1735 = vrot.lane.b32.xlu0 %v1734_v57, %s2887_s28  ;;  %v2690_v45 = vpack.c.bf16 %v1871_v41, %v1870_v17 }
0x15ad   :  { %1730 = vrot.lane.b32.xlu1 %v1728_v59, %s2888_s3  ;;  %v1874_v59 = vld [vmem:[%s3484_s6 + $0x60] sm:$0xff] }
0x161e   :  { %v1736_v60 = vpop.permute.xlu0 %1735 }
0x161f   :  { %v1731_v61 = vpop.permute.xlu1 %1730 }
0x1620   :  { %v1738_v62 = vsel %vm140_vm2, %v1731_v61, %v1736_v60  ;;  %v1875_v60 = vld [vmem:[%s3484_s6 + $0x68] sm:$0xff]  ;;  %v1892_v61 = vld [vmem:[%s3484_s6 + $0xf0] sm:$0xff] }
0x1621   :  { %v1740_v63 = vrot.slane %v1738_v62, 6  ;;  %v1893_v62 = vld [vmem:[%s3484_s6 + $0xf8] sm:$0xff] }
0x1623   :  { %2511 = vmatmul.mubr.msk.f32.vlgmr.msra.gmra.mrb[18].mxu1 %vm252_vm3, %v1740_v63  ;;  %v2700_v63 = vpack.c.bf16 %v1893_v62, %v1892_v61 }
0x1624   :  { %2521 = vmatprep.mubr.msk.f32.mxu1 %vm2885_vm1, %v2886_v7  ;;  %v2717_v7 = vpack.i.bf16 %v3087_v22, %v3250_v26  ;;  %v1880_v22 = vld [vmem:[%s3484_s6 + $0x90] sm:$0xff]  ;;  %v1881_v26 = vld [vmem:[%s3484_s6 + $0x98] sm:$0xff] }
0x1625   :  { %v2676_v25 = vpack.c.bf16 %v1881_v26, %v1880_v22 }
0x16f6   :  { %v1809_v0 = vpop.f32.mrb[18].mxu1 }
0x16f7   :  { %v1810_v1 = vadd.f32 %v3070_v48, %v1809_v0  ;;  %v2512_v2 = vpop.f32.mrb[19].mxu1  ;;  %v1878_v48 = vld [vmem:[%s3484_s6 + $0x80] sm:$0xff]  ;;  %v1876_v0 = vld [vmem:[%s3484_s6 + $0x70] sm:$0xff] }
0x16f8   :  { %v2672_v20 = vpack.c.bf16 %v1879_v18, %v1878_v48 }
0x16f9   :  { %2852 = vtanh.f32 %v1810_v1  ;;  %v2106_v5 = vmul.f32 -1.442695, %v1810_v1  ;;  %v1877_v1 = vld [vmem:[%s3484_s6 + $0x78] sm:$0xff] }
0x16fa   :  { %2673 = vmatprep.subr.bf16.mxu0 %v2672_v20  ;;  %v2702_v2 = vpack.c.bf16 %v1877_v1, %v1876_v0 }
0x16fb   :  { %2854 = vpow2.f32 %v2106_v5  ;;  %2675 = vmatpush3.bf16.msra.mxu0 %v2674_v24  ;;  %v2722_v5 = vpack.i.bf16 %v3128_v4, %v3290_v11 }
0x16fc   :  { %2677 = vmatprep.subr.bf16.mxu0 %v2676_v25 }
0x16ff   :  { %2679 = vmatpush3.bf16.msra.mxu0 %v2678_v56 }
0x1700   :  { %2681 = vmatprep.subr.bf16.mxu0 %v2680_v30  ;;  %v2107_v30 = vld [vmem:[%s3485_s7] ss:$0 sm:$0xff] }
0x1703   :  { %v2853_v3 = vpop.eup %2852  ;;  %2683 = vmatpush3.bf16.msra.mxu0 %v2682_v32 }
0x1704   :  { %1822 = vrot.lane.b32.xlu1 %v2853_v3, %s2887_s28  ;;  %2685 = vmatprep.subr.bf16.mxu0 %v2684_v33 }
0x1705   :  { %v2855_v8 = vpop.eup %2854 }
0x1706   :  { %v1816_v10 = vadd.f32 1.0, %v2855_v8 }
0x1707   :  { %2687 = vmatpush3.bf16.msra.mxu0 %v2686_v40 }
0x1708   :  { %2856 = vrcp.f32 %v1816_v10  ;;  %2689 = vmatprep.subr.bf16.mxu0 %v2688_v15 }
0x170b   :  { %2691 = vmatpush3.bf16.msra.mxu0 %v2690_v45 }
0x170c   :  { %2693 = vmatprep.subr.bf16.mxu0 %v2692_v46 }
0x170f   :  { %2695 = vmatpush3.bf16.msra.mxu0 %v2694_v51 }
0x1710   :  { %2697 = vmatprep.subr.bf16.mxu0 %v2696_v58 }
0x1712   :  { %v3330_v13 = vpop.eup %2856 }
0x1713   :  { %v1820_v52 = vmul.f32 %v3330_v13, %v3317_v47  ;;  %v2698_v47 = vpack.c.bf16 %v1875_v60, %v1874_v59 }
0x1715   :  { %2699 = vmatpush3.bf16.msra.mxu0 %v2698_v47 }
0x1716   :  { %2701 = vmatprep.subr.bf16.mxu0 %v2700_v63 }
0x1719   :  { %2703 = vmatpush3.bf16.msra.mxu0 %v2702_v2 }
0x1776   :  { %v1823_v14 = vpop.permute.xlu1 %1822 }
0x1777   :  { %v1825_v16 = vmul.f32 %v3330_v13, %v1823_v14 }
0x1779   :  { %1827 = vrot.lane.b32.xlu0 %v1825_v16, %s2888_s3 }
0x177d   :  { %2718 = vrot.lane.b32.xlu0 %v2717_v7, %s2888_s3 }
0x1781   :  { %2728 = vrot.lane.b32.xlu0 %v2727_v23, %s2889_s22 }
0x17eb   :  { %v1828_v53 = vpop.permute.xlu0 %1827 }
0x17ec   :  { %v1830_v57 = vadd.f32 %v1828_v53, %v1820_v52 }
0x17ee   :  { %2858 = vtanh.f32 %v1830_v57 }
0x17ef   :  { %v2719_v8 = vpop.permute.xlu0 %2718 }
0x17f0   :  { %v2721_v7 = vunpack.i.h.bf16 %v2719_v8  ;;  %v2720_v48 = vunpack.i.l.bf16 %v2719_v8 }
0x17f3   :  { %v2729_v14 = vpop.permute.xlu0 %2728 }
0x17f4   :  { %v2731_v20 = vunpack.i.h.bf16 %v2729_v14  ;;  %v2730_v21 = vunpack.i.l.bf16 %v2729_v14 }
0x17f8   :  { %v2859_v3 = vpop.eup %2858 }
0x17f9   :  { %1833 = vrot.lane.b32.xlu1 %v2859_v3, %s2887_s28 }
0x17fd   :  { %2723 = vrot.lane.b32.xlu1 %v2722_v5, %s2887_s28 }
0x186b   :  { %v1834_v10 = vpop.permute.xlu1 %1833 }
0x186c   :  { %v1836_v22 = vmul.f32 %v3330_v13, %v1834_v10  ;;  %v1973_v13 = vld [vmem:[%s3486_s8 + $0x8] sm:$0xff] }
0x186d   :  { %v2705_v27 = vpack.c.bf16 %v1973_v13, %v1972_v34 }
0x186f   :  { %v2724_v16 = vpop.permute.xlu1 %2723  ;;  %2706 = vmatpush3.bf16.msra.mxu1 %v2705_v27 }
0x1870   :  { %v2726_v18 = vunpack.i.h.bf16 %v2724_v16  ;;  %v2725_v19 = vunpack.i.l.bf16 %v2724_v16  ;;  %2707 = vmatprep.subr.bf16.mxu1 %v2884_v6  ;;  %v2108_v6 = vld [vmem:[%s3487_s9] ss:$0 sm:$0xff] }
0x1872   :  { %v1855_v26 = vsel %vm140_vm2, %v2721_v7, %v2726_v18  ;;  %v1859_v23 = vsel %vm140_vm2, %v2720_v48, %v2725_v19 }
0x1873   :  { %v1860_v4 = vsel %vm252_vm3, %v1859_v23, %v2730_v21  ;;  %v1856_v11 = vsel %vm252_vm3, %v1855_v26, %v2731_v20 }
0x1874   :  { %v1861_v24 = vsel %vm1857_vm4, %v1860_v4, %v1836_v22  ;;  %v1858_v25 = vsel %vm1857_vm4, %v1856_v11, %v3210_v42  ;;  %v1975_v42 = vld [vmem:[%s3486_s8 + $0x18] sm:$0xff]  ;;  %s2860_s8 = scalar_lea.vmem %s2065_s25, 32 }
0x1875   :  { %1965 = vmatprep.mubr.f32.mxu0 %v1861_v24  ;;  %v2708_v29 = vpack.c.bf16 %v1975_v42, %v1974_v28  ;;  %p2861_p0 = scmp.ne.s32.totalorder %s2065_s25, %s2860_s8  ;;  %p2866_p2 = scmp.lt.s32.totalorder %s2860_s8, %s2860_s8 }
0x1876   :  { %1966 = vmatmul.mubr.f32.vlgmr.msra.gmra.mrb[14].mxu0 %v1858_v25 }
0x1877   :  { %2709 = vmatpush3.bf16.msra.mxu1 %v2708_v29  ;;  %p2867_p3 = por %p2866_p2, %p2865_p1 }
0x1879   :  { %p2868_p4 = pnand %p2867_p3, %p2861_p0 }
0x1949   :  { %v2258_v56 = vpop.f32.mrb[14].mxu0 }
0x194a   :  { %v2259_v36 = vpop.f32.mrb[15].mxu0 }
0x194b   :  { %v2260_v31 = vadd.f32 %v2259_v36, %v2258_v56 }
0x194d   :  { %v1968_v39 = vadd.f32 %v2260_v31, %v2107_v30 }
0x194f   :  { %v1971_v43 = vmax.f32 %v1968_v39, 0.0 }
0x1951   :  { %2522 = vmatmul.mubr.msk.f32.vlgmr.msra.gmra.mrb[20].mxu1 %vm140_vm2, %v1971_v43 }
0x1a24   :  { %v2052_v32 = vpop.f32.mrb[20].mxu1 }
0x1a25   :  { %v2053_v33 = vadd.f32 %v2108_v6, %v2052_v32  ;;  %v2523_v35 = vpop.f32.mrb[21].mxu1 }
0x1a27   :  { %2057 = vst.msk [vmem:[#allocation2] sm:$0x3] %vm2056_vm5, %v2053_v33 }
0x1a28   :  { %2871 = shalt.err (!%p2868_p4)
}
0x1a29   :  { %s2872_s27 = scalar_lea.hbm %s3488_s10, 32 }
0x1a2a   :  { %p2873_p5 = scmp.ne.s32.totalorder %s3488_s10, %s2872_s27  ;;  %p2876_p6 = scmp.lt.u32.totalorder %s2872_s27, %s3488_s10 }
0x1a2c   :  { %p2878_p7 = pnand %p2876_p6, %p2873_p5 }
0x1a2e   :  { %2881 = shalt.err (!%p2878_p7)
}
0x1a2f   :  { %2067 = dma.vmem_to_hbm [thread:$0]  %s2065_s25, 32, %s3488_s10, [#allocation3]  }
0x1a30   :  { %2882 = dma.done.wait [#allocation3], 32  }
0x1a31   :  { %2883 = vsyncadd [#allocation3], 4294967264 }
0x1a32   :  { %2071 = vsyncpa [#allocation3], 1 }

</bundles_post_ra>
